<compile_context>
chip_gen: v6e
topology: v6e:2x2x1
jax: 0.10.0
libtpu: 0.0.40
codegen_flags: <defaults>
</compile_context>

<pallas_src>
import functools

import jax
import jax.numpy as jnp
from jax.experimental import pallas as pl
from jax.experimental.pallas import tpu as pltpu

_LANE = 128


def _round_up(n, m):
    return ((n + m - 1) // m) * m


def _mlp_kernel(x_ref, w1_ref, b1_ref, w2_ref, b2_ref, w3_ref, b3_ref, o_ref,
                *, log_softmax):
    """Fused 3-layer MLP: tanh -> tanh -> identity (+ optional log-softmax).

    Matmuls run in the weights' dtype (f32 or bf16) with f32 accumulation;
    bias-add, tanh and the softmax epilogue are always f32.
    """
    x = x_ref[...].astype(w1_ref.dtype)

    h = jnp.dot(x, w1_ref[...], preferred_element_type=jnp.float32)
    h = jnp.tanh(h + b1_ref[...])

    h = jnp.dot(h.astype(w2_ref.dtype), w2_ref[...],
                preferred_element_type=jnp.float32)
    h = jnp.tanh(h + b2_ref[...])

    logits = jnp.dot(h.astype(w3_ref.dtype), w3_ref[...],
                     preferred_element_type=jnp.float32)
    logits = logits + b3_ref[...]

    if log_softmax:
        # Fused Categorical(logits).log_prob support: log-softmax over the
        # (un-padded) action lanes while the logits tile is VMEM-resident.
        m = jnp.max(logits, axis=-1, keepdims=True)
        z = logits - m
        lse = jnp.log(jnp.sum(jnp.exp(z), axis=-1, keepdims=True))
        logits = z - lse

    o_ref[...] = logits.astype(o_ref.dtype)


def prepare_params(params, *, use_bf16=True):
    """One-time parameter prep (call once per parameter update, NOT per forward).

    params: ((W1, b1), (W2, b2), (W3, b3)), Wi in PyTorch layout [out, in].
    Returns (w1p, b1p, w2p, b2p, w3p, b3p) where:
      w1p: [in_dim, h1_p]   (real input rows, hidden cols padded to 128)
      w2p: [h1_p, h2_p]     (both hidden dims padded to 128)
      w3p: [h2_p, out_dim]  (real output cols -> lane-thin output, no padding)
      biases are f32 rows [1, cols] matching the weight column counts.
    """
    (w1, b1), (w2, b2), (w3, b3) = params
    h1, in_dim = w1.shape
    h2 = w2.shape[0]
    out_dim = w3.shape[0]
    h1_p = _round_up(h1, _LANE)
    h2_p = _round_up(h2, _LANE)

    cdt = jnp.bfloat16 if use_bf16 else jnp.float32

    def prep_w(w, rows_p, cols_p):
        wt = w.T.astype(jnp.float32)
        wt = jnp.pad(wt, ((0, rows_p - wt.shape[0]), (0, cols_p - wt.shape[1])))
        return wt.astype(cdt)

    def prep_b(b, cols_p):
        br = b.astype(jnp.float32)[None, :]
        return jnp.pad(br, ((0, 0), (0, cols_p - br.shape[1])))

    w1p = prep_w(w1, in_dim, h1_p)       # no row padding: K = in_dim
    w2p = prep_w(w2, h1_p, h2_p)
    w3p = prep_w(w3, h2_p, out_dim)      # no column padding: N = out_dim
    b1p = prep_b(b1, h1_p)
    b2p = prep_b(b2, h2_p)
    b3p = prep_b(b3, out_dim)
    return (w1p, b1p, w2p, b2p, w3p, b3p)


def _choose_batch_tile(B):
    """Large tiles (<=1024 rows) to amortize per-step overhead, but keep >=2
    grid steps whenever possible so v7x can shard the parallel axis across
    both TensorCores.  Tiles this size stay well under v5e's 16 MiB VMEM."""
    b8 = _round_up(B, 8)
    if b8 <= 8:
        return b8
    return min(1024, _round_up((b8 + 1) // 2, 8))


def policy_network_forward(x, prepared, *, batch_tile=None, log_softmax=False):
    """Run the fused MLP Pallas kernel.

    x:        [B, in_dim] observations (float32; cast to the weights' compute
              dtype inside the kernel, so no wrapper-side cast/pad on x).
    prepared: output of prepare_params().
    Returns:  [B, out_dim] float32 logits (or log-probs if log_softmax=True).
    """
    w1p, b1p, w2p, b2p, w3p, b3p = prepared
    B, in_dim = x.shape
    assert w1p.shape[0] == in_dim, "prepared params do not match x's feature dim"
    h1_p = w1p.shape[1]
    h2_p = w2p.shape[1]
    out_dim = w3p.shape[1]

    if batch_tile is None:
        batch_tile = _choose_batch_tile(B)
    batch_tile = max(8, _round_up(int(batch_tile), 8))

    # Pad batch rows only if needed (no lane padding anywhere).
    Bp = _round_up(B, batch_tile)
    xp = x if Bp == B else jnp.pad(x, ((0, Bp - B), (0, 0)))
    grid = (Bp // batch_tile,)

    # Weights/biases: full blocks with constant index_map -> VMEM-resident
    # across grid steps (no per-step re-DMA).  Only x / output tile the batch.
    full = lambda r, c: pl.BlockSpec((r, c), lambda i: (0, 0))

    kernel = functools.partial(_mlp_kernel, log_softmax=log_softmax)

    out = pl.pallas_call(
        kernel,
        out_shape=jax.ShapeDtypeStruct((Bp, out_dim), jnp.float32),
        grid_spec=pltpu.PrefetchScalarGridSpec(
            num_scalar_prefetch=0,
            grid=grid,
            in_specs=[
                pl.BlockSpec((batch_tile, in_dim), lambda i: (i, 0)),  # x (un-padded lanes)
                full(in_dim, h1_p), full(1, h1_p),                     # layer 1
                full(h1_p, h2_p), full(1, h2_p),                       # layer 2
                full(h2_p, out_dim), full(1, out_dim),                 # layer 3
            ],
            out_specs=pl.BlockSpec((batch_tile, out_dim), lambda i: (i, 0)),
        ),
        compiler_params=pltpu.CompilerParams(
            dimension_semantics=("parallel",),
        ),
    )(xp, w1p, b1p, w2p, b2p, w3p, b3p)

    return out if Bp == B else out[:B]


def init_linear(key, out_features, in_features):
    """Deterministic PyTorch-style Linear init: U(-1/sqrt(fan_in), 1/sqrt(fan_in))."""
    kw, kb = jax.random.split(key)
    bound = 1.0 / jnp.sqrt(jnp.float32(in_features))
    w = jax.random.uniform(kw, (out_features, in_features), jnp.float32, -bound, bound)
    b = jax.random.uniform(kb, (out_features,), jnp.float32, -bound, bound)
    return w, b


def reference_forward(x, params):
    (w1, b1), (w2, b2), (w3, b3) = params
    h = jnp.tanh(x @ w1.T + b1)
    h = jnp.tanh(h @ w2.T + b2)
    return h @ w3.T + b3


if __name__ == "__main__":
    # sizes = [obs_dim, hidden, hidden, n_actions] -> PolicyNetwork(sizes, Tanh, Identity)
    sizes = [4, 32, 32, 2]
    B = 1024  # rollout-sized batch -> auto tile 512, 2-step parallel grid (v7x friendly)

    key = jax.random.PRNGKey(0)
    kx, k1, k2, k3 = jax.random.split(key, 4)

    x = jax.random.normal(kx, (B, sizes[0]), jnp.float32)
    params = (
        init_linear(k1, sizes[1], sizes[0]),
        init_linear(k2, sizes[2], sizes[1]),
        init_linear(k3, sizes[3], sizes[2]),
    )
    ref = reference_forward(x, params)

    # Parameter prep hoisted out of the forward: done once per parameter update.
    prep_f32 = prepare_params(params, use_bf16=False)
    prep_bf16 = prepare_params(params, use_bf16=True)  # default fast path (v6e/v7x)

    # f32 path.
    logits = jax.block_until_ready(policy_network_forward(x, prep_f32))
    assert logits.shape == (B, sizes[-1])
    assert jnp.allclose(logits, ref, atol=1e-4, rtol=1e-4)

    # bf16 MXU path: bf16 weights/activations into the MXU, f32 accumulation.
    logits_bf16 = jax.block_until_ready(policy_network_forward(x, prep_bf16))
    assert logits_bf16.shape == (B, sizes[-1])
    assert jnp.allclose(logits_bf16, ref, atol=5e-2, rtol=5e-2)

    # Ragged batch (exercises wrapper-side row padding / row slicing only).
    logits_r = jax.block_until_ready(policy_network_forward(x[:1000], prep_f32))
    assert logits_r.shape == (1000, sizes[-1])
    assert jnp.allclose(logits_r, ref[:1000], atol=1e-4, rtol=1e-4)

    # Fused log-softmax epilogue (Categorical log-probs) on VMEM-resident logits.
    logp = jax.block_until_ready(
        policy_network_forward(x, prep_f32, log_softmax=True))
    assert jnp.allclose(logp, jax.nn.log_softmax(ref, axis=-1), atol=1e-4, rtol=1e-4)

    # TODO(synk): get_action's Categorical.sample() (host-side RNG) and the Adam
    # training loop remain standard JAX glue outside the kernel.
    print("KERNEL_OK")
</pallas_src>

<mosaic_0001>
module attributes {stable_mosaic.version = 11 : i64} {
  func.func @_mlp_kernel(%arg0: i32, %arg1: memref<512x4xf32, #tpu.memory_space<vmem>>, %arg2: memref<4x128xf32, #tpu.memory_space<vmem>>, %arg3: memref<1x128xf32, #tpu.memory_space<vmem>>, %arg4: memref<128x128xf32, #tpu.memory_space<vmem>>, %arg5: memref<1x128xf32, #tpu.memory_space<vmem>>, %arg6: memref<128x2xf32, #tpu.memory_space<vmem>>, %arg7: memref<1x2xf32, #tpu.memory_space<vmem>>, %arg8: memref<512x2xf32, #tpu.memory_space<vmem>>) attributes {dimension_semantics = [#tpu.dimension_semantics<parallel>], iteration_bounds = array<i64: 2>, scalar_prefetch = 0 : i64, scratch_operands = 0 : i64, tpu.core_type = #tpu.core_type<tc>, window_params = [{transform_indices = @transform_0, window_bounds = array<i64: 512, 4>}, {pipeline_mode = #tpu.pipeline_mode<synchronous>, transform_indices = @transform_1, window_bounds = array<i64: 4, 128>}, {pipeline_mode = #tpu.pipeline_mode<synchronous>, transform_indices = @transform_2, window_bounds = array<i64: 1, 128>}, {pipeline_mode = #tpu.pipeline_mode<synchronous>, transform_indices = @transform_3, window_bounds = array<i64: 128, 128>}, {pipeline_mode = #tpu.pipeline_mode<synchronous>, transform_indices = @transform_4, window_bounds = array<i64: 1, 128>}, {pipeline_mode = #tpu.pipeline_mode<synchronous>, transform_indices = @transform_5, window_bounds = array<i64: 128, 2>}, {pipeline_mode = #tpu.pipeline_mode<synchronous>, transform_indices = @transform_6, window_bounds = array<i64: 1, 2>}, {transform_indices = @transform_7, window_bounds = array<i64: 512, 2>}]} {
    %c0 = arith.constant 0 : index
    %c0_0 = arith.constant 0 : index
    %0 = vector.load %arg1[%c0, %c0_0] : memref<512x4xf32, #tpu.memory_space<vmem>>, vector<512x4xf32>
    %c0_1 = arith.constant 0 : index
    %c0_2 = arith.constant 0 : index
    %1 = vector.load %arg2[%c0_1, %c0_2] : memref<4x128xf32, #tpu.memory_space<vmem>>, vector<4x128xf32>
    %cst = arith.constant dense<0.000000e+00> : vector<512x128xf32>
    %2 = tpu.matmul %0, %1, %cst {dimension_numbers = #tpu.dot_dimension_numbers<[1], [0], [0], [1], [0, 0, 1, 1], [], []>} : vector<512x4xf32>, vector<4x128xf32>, vector<512x128xf32> -> vector<512x128xf32>
    %c0_3 = arith.constant 0 : index
    %c0_4 = arith.constant 0 : index
    %3 = vector.load %arg3[%c0_3, %c0_4] : memref<1x128xf32, #tpu.memory_space<vmem>>, vector<1x128xf32>
    %4 = vector.broadcast %3 : vector<1x128xf32> to vector<512x128xf32>
    %5 = arith.addf %2, %4 : vector<512x128xf32>
    %6 = math.tanh %5 : vector<512x128xf32>
    %c0_5 = arith.constant 0 : index
    %c0_6 = arith.constant 0 : index
    %7 = vector.load %arg4[%c0_5, %c0_6] : memref<128x128xf32, #tpu.memory_space<vmem>>, vector<128x128xf32>
    %cst_7 = arith.constant dense<0.000000e+00> : vector<512x128xf32>
    %8 = tpu.matmul %6, %7, %cst_7 {dimension_numbers = #tpu.dot_dimension_numbers<[1], [0], [0], [1], [0, 0, 1, 1], [], []>} : vector<512x128xf32>, vector<128x128xf32>, vector<512x128xf32> -> vector<512x128xf32>
    %c0_8 = arith.constant 0 : index
    %c0_9 = arith.constant 0 : index
    %9 = vector.load %arg5[%c0_8, %c0_9] : memref<1x128xf32, #tpu.memory_space<vmem>>, vector<1x128xf32>
    %10 = vector.broadcast %9 : vector<1x128xf32> to vector<512x128xf32>
    %11 = arith.addf %8, %10 : vector<512x128xf32>
    %12 = math.tanh %11 : vector<512x128xf32>
    %c0_10 = arith.constant 0 : index
    %c0_11 = arith.constant 0 : index
    %13 = vector.load %arg6[%c0_10, %c0_11] : memref<128x2xf32, #tpu.memory_space<vmem>>, vector<128x2xf32>
    %cst_12 = arith.constant dense<0.000000e+00> : vector<512x2xf32>
    %14 = tpu.matmul %12, %13, %cst_12 {dimension_numbers = #tpu.dot_dimension_numbers<[1], [0], [0], [1], [0, 0, 1, 1], [], []>} : vector<512x128xf32>, vector<128x2xf32>, vector<512x2xf32> -> vector<512x2xf32>
    %c0_13 = arith.constant 0 : index
    %c0_14 = arith.constant 0 : index
    %15 = vector.load %arg7[%c0_13, %c0_14] : memref<1x2xf32, #tpu.memory_space<vmem>>, vector<1x2xf32>
    %16 = vector.broadcast %15 : vector<1x2xf32> to vector<512x2xf32>
    %17 = arith.addf %14, %16 : vector<512x2xf32>
    %c0_15 = arith.constant 0 : index
    %c0_16 = arith.constant 0 : index
    %18 = vector.load %arg8[%c0_15, %c0_16] : memref<512x2xf32, #tpu.memory_space<vmem>>, vector<512x2xf32>
    tpu.vector_store %arg8[%c0_15, %c0_16], %17 {strides = array<i32>} : memref<512x2xf32, #tpu.memory_space<vmem>>, vector<512x2xf32>,
    return
  }
  func.func @transform_0(%arg0: i32) -> (i32, i32) {
    %c0_i32 = arith.constant 0 : i32
    %c0_i32_0 = arith.constant 0 : i32
    return %arg0, %c0_i32 : i32, i32
  }
  func.func @transform_1(%arg0: i32) -> (i32, i32) {
    %c0_i32 = arith.constant 0 : i32
    %c0_i32_0 = arith.constant 0 : i32
    %c0_i32_1 = arith.constant 0 : i32
    return %c0_i32, %c0_i32_0 : i32, i32
  }
  func.func @transform_2(%arg0: i32) -> (i32, i32) {
    %c0_i32 = arith.constant 0 : i32
    %c0_i32_0 = arith.constant 0 : i32
    %c0_i32_1 = arith.constant 0 : i32
    return %c0_i32, %c0_i32_0 : i32, i32
  }
  func.func @transform_3(%arg0: i32) -> (i32, i32) {
    %c0_i32 = arith.constant 0 : i32
    %c0_i32_0 = arith.constant 0 : i32
    %c0_i32_1 = arith.constant 0 : i32
    return %c0_i32, %c0_i32_0 : i32, i32
  }
  func.func @transform_4(%arg0: i32) -> (i32, i32) {
    %c0_i32 = arith.constant 0 : i32
    %c0_i32_0 = arith.constant 0 : i32
    %c0_i32_1 = arith.constant 0 : i32
    return %c0_i32, %c0_i32_0 : i32, i32
  }
  func.func @transform_5(%arg0: i32) -> (i32, i32) {
    %c0_i32 = arith.constant 0 : i32
    %c0_i32_0 = arith.constant 0 : i32
    %c0_i32_1 = arith.constant 0 : i32
    return %c0_i32, %c0_i32_0 : i32, i32
  }
  func.func @transform_6(%arg0: i32) -> (i32, i32) {
    %c0_i32 = arith.constant 0 : i32
    %c0_i32_0 = arith.constant 0 : i32
    %c0_i32_1 = arith.constant 0 : i32
    return %c0_i32, %c0_i32_0 : i32, i32
  }
  func.func @transform_7(%arg0: i32) -> (i32, i32) {
    %c0_i32 = arith.constant 0 : i32
    %c0_i32_0 = arith.constant 0 : i32
    return %arg0, %c0_i32 : i32, i32
  }
}

</mosaic_0001>

<bundles_post_ra>
// kernel: tpu_custom_call.1
= control target key start
LH: loop header
LB: loop body
LE: loop exit
PB: predicated region body
PF: predicated region fallthrough
CT: control target
= control target key end

     0   :  { %s2973_s24 = smov 0   ;;  %s3632_s0 = inlined_call_operand.vmem [shape: f32[1024,4], index: 0, kind: input, shape index: {}]   ;;  %s3633_s1 = inlined_call_operand.vmem [shape: f32[4,128], index: 1, kind: input, shape index: {}]   ;;  %s3634_s2 = inlined_call_operand.vmem [shape: f32[1,128], index: 2, kind: input, shape index: {}]   ;;  %s3635_s3 = inlined_call_operand.vmem [shape: f32[128,128], index: 3, kind: input, shape index: {}]   ;;  %s3636_s4 = inlined_call_operand.vmem [shape: f32[1,128], index: 4, kind: input, shape index: {}]   ;;  %s3637_s5 = inlined_call_operand.vmem [shape: f32[128,2], index: 5, kind: input, shape index: {}]   ;;  %s3638_s6 = inlined_call_operand.vmem [shape: f32[1,2], index: 6, kind: input, shape index: {}]   ;;  %s3639_s7 = inlined_call_operand.vmem [shape: f32[1024,2], index: 7, kind: output, shape index: {}]  }
   0x1 LB: > { %s2001_s25 = sadd.s32 4294967295, %s2931_s24   ;;  %p2005_p0 = scmp.ge.s32.totalorder %s2931_s24, 1  ;;  %s2931_s24 = sphi %s2973_s24, %s17_s24  }
   0x2   : > { %p238_p1 = scmp.lt.s32.totalorder %s2931_s24, 3 }
   0x4   : > { %p239_p2 = pnand %p2005_p0, %p238_p1 }
   0x5   : > { %s2006_s28 = sshll.u32 (!%p239_p2), %s2001_s25, 6 }
   0x6   : > { %242 = sbr.rel (%p239_p2) target bundleno = 762 (0x2fa), region = 48  ;;  %p271_p3 = scmp.lt.s32.totalorder (!%p239_p2), %s2006_s28, 127 }
   0xb   : > { %v346_v0 = vld [vmem:[%s3633_s1] sm:$0xf]  ;;  %vm547_vm0 = vcmask 1043456   ;;  %v1015_v1 = vld [vmem:[%s3635_s3 + $0x78] sm:$0xff]  ;;  %s3641_s28 = smov (!%p271_p3, %s2006_s28), 127  ;;  %vm354_vm1 = vcmask 31744  }
   0xc   : > { %2305 = vmatprep.subr.msk.mxu0 %vm547_vm0, %v346_v0  ;;  %2659 = vmatprep.subr.msk.mxu1 %vm547_vm0, %v346_v0  ;;  %s2007_s8 = sshll.u32 %s3641_s28, 3  ;;  %v1014_v10 = vld [vmem:[%s3635_s3 + $0x70] sm:$0xff]  ;;  %v1013_v16 = vld [vmem:[%s3635_s3 + $0x68] sm:$0xff]  ;;  %v1012_v19 = vld [vmem:[%s3635_s3 + $0x60] sm:$0xff]  ;;  %vm1880_vm2 = vcmask 15360  }
   0xd   : > { %2306 = vmatpush3.msk.msra.mxu0 %vm547_vm0, %v346_v0  ;;  %2660 = vmatpush3.msk.msra.mxu1 %vm547_vm0, %v346_v0  ;;  %s2995_s11 = scalar_lea.vmem %s3632_s0, %s2007_s8  ;;  %v1011_v22 = vld [vmem:[%s3635_s3 + $0x58] sm:$0xff]  ;;  %v1010_v25 = vld [vmem:[%s3635_s3 + $0x50] sm:$0xff]  ;;  %v1009_v28 = vld [vmem:[%s3635_s3 + $0x48] sm:$0xff]  ;;  %s3435_s22 = scalar_lea.vmem %s3639_s7, %s2007_s8 }
   0xe   : > { %2403 = vmatprep.subr.mxu1 %v1015_v1  ;;  %v282_v2 = vld [vmem:[%s2995_s11] sm:$0xff]  ;;  %v283_v3 = vld [vmem:[%s2995_s11 + $0x8] sm:$0xff]  ;;  %v284_v4 = vld [vmem:[%s2995_s11 + $0x10] sm:$0xff] }
   0xf   : > { %2307 = vmatprep.mubr.msk.f32.mxu0 %vm354_vm1, %v282_v2  ;;  %v285_v5 = vld [vmem:[%s2995_s11 + $0x18] sm:$0xff]  ;;  %v286_v6 = vld [vmem:[%s2995_s11 + $0x20] sm:$0xff]  ;;  %v287_v7 = vld [vmem:[%s2995_s11 + $0x28] sm:$0xff] }
  0x10   : > { %2308 = vmatmul.mubr.msk.f32.vlgmr.msra.gmra.mxu0 %vm354_vm1, %v283_v3  ;;  %v288_v8 = vld [vmem:[%s2995_s11 + $0x30] sm:$0xff]  ;;  %v314_v9 = vld [vmem:[%s2995_s11 + $0x100] sm:$0xff]  ;;  %v289_v11 = vld [vmem:[%s2995_s11 + $0x38] sm:$0xff] }
  0x11   : > { %2310 = vmatprep.mubr.msk.f32.mxu0 %vm354_vm1, %v284_v4  ;;  %2355 = vmatprep.mubr.msk.f32.mxu1 %vm354_vm1, %v314_v9  ;;  %v315_v12 = vld [vmem:[%s2995_s11 + $0x108] sm:$0xff]  ;;  %v316_v13 = vld [vmem:[%s2995_s11 + $0x110] sm:$0xff]  ;;  %v290_v14 = vld [vmem:[%s2995_s11 + $0x40] sm:$0xff] }
  0x12   : > { %2356 = vmatmul.mubr.msk.f32.vlgmr.msra.gmra.mxu1 %vm354_vm1, %v315_v12  ;;  %v317_v15 = vld [vmem:[%s2995_s11 + $0x118] sm:$0xff]  ;;  %v318_v17 = vld [vmem:[%s2995_s11 + $0x120] sm:$0xff]  ;;  %v291_v18 = vld [vmem:[%s2995_s11 + $0x48] sm:$0xff] }
  0x13   : > { %2358 = vmatprep.mubr.msk.f32.mxu1 %vm354_vm1, %v316_v13  ;;  %2404 = vmatpush3.msra.mxu1 %v1015_v1  ;;  %v292_v20 = vld [vmem:[%s2995_s11 + $0x50] sm:$0xff]  ;;  %v319_v21 = vld [vmem:[%s2995_s11 + $0x128] sm:$0xff]  ;;  %v293_v24 = vld [vmem:[%s2995_s11 + $0x58] sm:$0xff] }
  0x14   : > { %2311 = vmatmul.mubr.msk.f32.gmra.mxu0 %vm354_vm1, %v285_v5  ;;  %2405 = vmatprep.subr.mxu1 %v1014_v10  ;;  %v320_v23 = vld [vmem:[%s2995_s11 + $0x130] sm:$0xff]  ;;  %v294_v26 = vld [vmem:[%s2995_s11 + $0x60] sm:$0xff]  ;;  %v321_v27 = vld [vmem:[%s2995_s11 + $0x138] sm:$0xff] }
  0x15   : > { %2313 = vmatprep.mubr.msk.f32.mxu0 %vm354_vm1, %v286_v6  ;;  %2406 = vmatpush3.msra.mxu1 %v1014_v10  ;;  %v322_v29 = vld [vmem:[%s2995_s11 + $0x140] sm:$0xff]  ;;  %v295_v30 = vld [vmem:[%s2995_s11 + $0x68] sm:$0xff]  ;;  %v296_v32 = vld [vmem:[%s2995_s11 + $0x70] sm:$0xff] }
  0x16   : > { %2359 = vmatmul.mubr.msk.f32.gmra.mxu1 %vm354_vm1, %v317_v15  ;;  %2407 = vmatprep.subr.mxu1 %v1013_v16  ;;  %v1008_v31 = vld [vmem:[%s3635_s3 + $0x40] sm:$0xff]  ;;  %v323_v33 = vld [vmem:[%s2995_s11 + $0x148] sm:$0xff]  ;;  %v1007_v34 = vld [vmem:[%s3635_s3 + $0x38] sm:$0xff] }
  0x17   : > { %2361 = vmatprep.mubr.msk.f32.mxu1 %vm354_vm1, %v318_v17  ;;  %2408 = vmatpush3.msra.mxu1 %v1013_v16  ;;  %v324_v35 = vld [vmem:[%s2995_s11 + $0x150] sm:$0xff]  ;;  %v297_v36 = vld [vmem:[%s2995_s11 + $0x78] sm:$0xff]  ;;  %v298_v38 = vld [vmem:[%s2995_s11 + $0x80] sm:$0xff] }
  0x18   : > { %2314 = vmatmul.mubr.msk.f32.gmra.mxu0 %vm354_vm1, %v287_v7  ;;  %2409 = vmatprep.subr.mxu1 %v1012_v19  ;;  %v1006_v37 = vld [vmem:[%s3635_s3 + $0x30] sm:$0xff]  ;;  %v325_v39 = vld [vmem:[%s2995_s11 + $0x158] sm:$0xff]  ;;  %v1005_v40 = vld [vmem:[%s3635_s3 + $0x28] sm:$0xff] }
  0x19   : > { %2316 = vmatprep.mubr.msk.f32.mxu0 %vm354_vm1, %v288_v8  ;;  %2410 = vmatpush3.msra.mxu1 %v1012_v19  ;;  %v326_v41 = vld [vmem:[%s2995_s11 + $0x160] sm:$0xff]  ;;  %v299_v42 = vld [vmem:[%s2995_s11 + $0x88] sm:$0xff]  ;;  %v300_v44 = vld [vmem:[%s2995_s11 + $0x90] sm:$0xff] }
  0x1a   : > { %2362 = vmatmul.mubr.msk.f32.gmra.mxu1 %vm354_vm1, %v319_v21  ;;  %2411 = vmatprep.subr.mxu1 %v1011_v22  ;;  %v1004_v43 = vld [vmem:[%s3635_s3 + $0x20] sm:$0xff]  ;;  %v327_v45 = vld [vmem:[%s2995_s11 + $0x168] sm:$0xff]  ;;  %v328_v46 = vld [vmem:[%s2995_s11 + $0x170] sm:$0xff] }
  0x1b   : > { %2364 = vmatprep.mubr.msk.f32.mxu1 %vm354_vm1, %v320_v23  ;;  %2412 = vmatpush3.msra.mxu1 %v1011_v22  ;;  %v301_v47 = vld [vmem:[%s2995_s11 + $0x98] sm:$0xff]  ;;  %v302_v48 = vld [vmem:[%s2995_s11 + $0xa0] sm:$0xff]  ;;  %v303_v51 = vld [vmem:[%s2995_s11 + $0xa8] sm:$0xff] }
  0x1c   : > { %2317 = vmatmul.mubr.msk.f32.gmra.mxu0 %vm354_vm1, %v289_v11  ;;  %2413 = vmatprep.subr.mxu1 %v1010_v25  ;;  %v329_v49 = vld [vmem:[%s2995_s11 + $0x178] sm:$0xff]  ;;  %v330_v50 = vld [vmem:[%s2995_s11 + $0x180] sm:$0xff]  ;;  %v304_v52 = vld [vmem:[%s2995_s11 + $0xb0] sm:$0xff] }
  0x1d   : > { %2319 = vmatprep.mubr.msk.f32.mxu0 %vm354_vm1, %v290_v14  ;;  %2414 = vmatpush3.msra.mxu1 %v1010_v25  ;;  %v331_v53 = vld [vmem:[%s2995_s11 + $0x188] sm:$0xff]  ;;  %v332_v54 = vld [vmem:[%s2995_s11 + $0x190] sm:$0xff]  ;;  %v305_v55 = vld [vmem:[%s2995_s11 + $0xb8] sm:$0xff] }
  0x1e   : > { %2365 = vmatmul.mubr.msk.f32.gmra.mxu1 %vm354_vm1, %v321_v27  ;;  %2415 = vmatprep.subr.mxu1 %v1009_v28  ;;  %v306_v56 = vld [vmem:[%s2995_s11 + $0xc0] sm:$0xff]  ;;  %v333_v57 = vld [vmem:[%s2995_s11 + $0x198] sm:$0xff]  ;;  %v307_v59 = vld [vmem:[%s2995_s11 + $0xc8] sm:$0xff] }
  0x1f   : > { %2367 = vmatprep.mubr.msk.f32.mxu1 %vm354_vm1, %v322_v29  ;;  %2416 = vmatpush3.msra.mxu1 %v1009_v28  ;;  %v334_v58 = vld [vmem:[%s2995_s11 + $0x1a0] sm:$0xff]  ;;  %v308_v60 = vld [vmem:[%s2995_s11 + $0xd0] sm:$0xff]  ;;  %v335_v61 = vld [vmem:[%s2995_s11 + $0x1a8] sm:$0xff] }
  0x20   : > { %2320 = vmatmul.mubr.msk.f32.gmra.mxu0 %vm354_vm1, %v291_v18  ;;  %2417 = vmatprep.subr.mxu1 %v1008_v31  ;;  %v336_v62 = vld [vmem:[%s2995_s11 + $0x1b0] sm:$0xff]  ;;  %v309_v63 = vld [vmem:[%s2995_s11 + $0xd8] sm:$0xff]  ;;  %v310_v0 = vld [vmem:[%s2995_s11 + $0xe0] sm:$0xff] }
  0x21   : > { %2322 = vmatprep.mubr.msk.f32.mxu0 %vm354_vm1, %v292_v20  ;;  %2418 = vmatpush3.msra.mxu1 %v1008_v31  ;;  %v337_v1 = vld [vmem:[%s2995_s11 + $0x1b8] sm:$0xff]  ;;  %v338_v2 = vld [vmem:[%s2995_s11 + $0x1c0] sm:$0xff]  ;;  %v311_v3 = vld [vmem:[%s2995_s11 + $0xe8] sm:$0xff] }
  0x22   : > { %2368 = vmatmul.mubr.msk.f32.gmra.mxu1 %vm354_vm1, %v323_v33  ;;  %2419 = vmatprep.subr.mxu1 %v1007_v34  ;;  %v312_v4 = vld [vmem:[%s2995_s11 + $0xf0] sm:$0xff]  ;;  %v339_v5 = vld [vmem:[%s2995_s11 + $0x1c8] sm:$0xff]  ;;  %v313_v7 = vld [vmem:[%s2995_s11 + $0xf8] sm:$0xff] }
  0x23   : > { %2370 = vmatprep.mubr.msk.f32.mxu1 %vm354_vm1, %v324_v35  ;;  %2420 = vmatpush3.msra.mxu1 %v1007_v34  ;;  %v340_v6 = vld [vmem:[%s2995_s11 + $0x1d0] sm:$0xff]  ;;  %v341_v8 = vld [vmem:[%s2995_s11 + $0x1d8] sm:$0xff]  ;;  %v342_v9 = vld [vmem:[%s2995_s11 + $0x1e0] sm:$0xff] }
  0x24   : > { %2323 = vmatmul.mubr.msk.f32.gmra.mxu0 %vm354_vm1, %v293_v24  ;;  %2421 = vmatprep.subr.mxu1 %v1006_v37  ;;  %v343_v10 = vld [vmem:[%s2995_s11 + $0x1e8] sm:$0xff]  ;;  %v344_v11 = vld [vmem:[%s2995_s11 + $0x1f0] sm:$0xff]  ;;  %v345_v12 = vld [vmem:[%s2995_s11 + $0x1f8] sm:$0xff] }
  0x25   : > { %2325 = vmatprep.mubr.msk.f32.mxu0 %vm354_vm1, %v294_v26  ;;  %2422 = vmatpush3.msra.mxu1 %v1006_v37  ;;  %v1003_v13 = vld [vmem:[%s3635_s3 + $0x18] sm:$0xff]  ;;  %v1002_v14 = vld [vmem:[%s3635_s3 + $0x10] sm:$0xff]  ;;  %v1001_v15 = vld [vmem:[%s3635_s3 + $0x8] sm:$0xff] }
  0x26   : > { %2371 = vmatmul.mubr.msk.f32.gmra.mxu1 %vm354_vm1, %v325_v39  ;;  %2423 = vmatprep.subr.mxu1 %v1005_v40  ;;  %v1000_v16 = vld [vmem:[%s3635_s3] sm:$0xff]  ;;  %v1487_v39 = vld [vmem:[%s3637_s5 + $0x78] sm:$0xff] }
  0x27   : > { %2373 = vmatprep.mubr.msk.f32.mxu1 %vm354_vm1, %v326_v41  ;;  %2424 = vmatpush3.msra.mxu1 %v1005_v40  ;;  %v3173_v17 = vld [vmem:[%s3634_s2] ss:$0 sm:$0xff]  ;;  %v1486_v40 = vld [vmem:[%s3637_s5 + $0x70] sm:$0xff] }
  0x28   : > { %2326 = vmatmul.mubr.msk.f32.gmra.mxu0 %vm354_vm1, %v295_v30  ;;  %2425 = vmatprep.subr.mxu1 %v1004_v43 }
  0x29   : > { %2328 = vmatprep.mubr.msk.f32.mxu0 %vm354_vm1, %v296_v32  ;;  %2426 = vmatpush3.msra.mxu1 %v1004_v43 }
  0x2a   : > { %2374 = vmatmul.mubr.msk.f32.gmra.mxu1 %vm354_vm1, %v327_v45  ;;  %2427 = vmatprep.subr.mxu1 %v1003_v13  ;;  %v1485_v45 = vld [vmem:[%s3637_s5 + $0x68] sm:$0xff] }
  0x2b   : > { %2376 = vmatprep.mubr.msk.f32.mxu1 %vm354_vm1, %v328_v46  ;;  %2428 = vmatpush3.msra.mxu1 %v1003_v13 }
  0x2c   : > { %2329 = vmatmul.mubr.msk.f32.gmra.mxu0 %vm354_vm1, %v297_v36  ;;  %2429 = vmatprep.subr.mxu1 %v1002_v14 }
  0x2d   : > { %2331 = vmatprep.mubr.msk.f32.mxu0 %vm354_vm1, %v298_v38  ;;  %2430 = vmatpush3.msra.mxu1 %v1002_v14  ;;  %v1478_v14 = vld [vmem:[%s3637_s5 + $0x30] sm:$0xff] }
  0x2e   : > { %2377 = vmatmul.mubr.msk.f32.gmra.mxu1 %vm354_vm1, %v329_v49  ;;  %2431 = vmatprep.subr.mxu1 %v1001_v15 }
  0x2f   : > { %2379 = vmatprep.mubr.msk.f32.mxu1 %vm354_vm1, %v330_v50  ;;  %2432 = vmatpush3.msra.mxu1 %v1001_v15  ;;  %v1484_v50 = vld [vmem:[%s3637_s5 + $0x60] sm:$0xff] }
  0x30   : > { %2332 = vmatmul.mubr.msk.f32.gmra.mxu0 %vm354_vm1, %v299_v42  ;;  %2433 = vmatprep.subr.mxu1 %v1000_v16 }
  0x31   : > { %2334 = vmatprep.mubr.msk.f32.mxu0 %vm354_vm1, %v300_v44  ;;  %2434 = vmatpush3.msra.mxu1 %v1000_v16 }
  0x32   : > { %2380 = vmatmul.mubr.msk.f32.gmra.mxu1 %vm354_vm1, %v331_v53  ;;  %2531 = vmatprep.subr.mxu0 %v1487_v39 }
  0x33   : > { %2382 = vmatprep.mubr.msk.f32.mxu1 %vm354_vm1, %v332_v54  ;;  %2532 = vmatpush3.msra.mxu0 %v1487_v39 }
  0x34   : > { %2335 = vmatmul.mubr.msk.f32.gmra.mxu0 %vm354_vm1, %v301_v47  ;;  %2533 = vmatprep.subr.mxu0 %v1486_v40 }
  0x35   : > { %2337 = vmatprep.mubr.msk.f32.mxu0 %vm354_vm1, %v302_v48  ;;  %2534 = vmatpush3.msra.mxu0 %v1486_v40 }
  0x36   : > { %2383 = vmatmul.mubr.msk.f32.gmra.mxu1 %vm354_vm1, %v333_v57  ;;  %2535 = vmatprep.subr.mxu0 %v1485_v45 }
  0x37   : > { %2385 = vmatprep.mubr.msk.f32.mxu1 %vm354_vm1, %v334_v58  ;;  %2536 = vmatpush3.msra.mxu0 %v1485_v45 }
  0x38   : > { %2338 = vmatmul.mubr.msk.f32.gmra.mxu0 %vm354_vm1, %v303_v51  ;;  %2537 = vmatprep.subr.mxu0 %v1484_v50 }
  0x39   : > { %2340 = vmatprep.mubr.msk.f32.mxu0 %vm354_vm1, %v304_v52  ;;  %2538 = vmatpush3.msra.mxu0 %v1484_v50 }
  0x3a   : > { %2386 = vmatmul.mubr.msk.f32.gmra.mxu1 %vm354_vm1, %v335_v61 }
  0x3b   : > { %2388 = vmatprep.mubr.msk.f32.mxu1 %vm354_vm1, %v336_v62 }
  0x3c   : > { %2341 = vmatmul.mubr.msk.f32.gmra.mxu0 %vm354_vm1, %v305_v55  ;;  %v1483_v55 = vld [vmem:[%s3637_s5 + $0x58] sm:$0xff] }
  0x3d   : > { %2343 = vmatprep.mubr.msk.f32.mxu0 %vm354_vm1, %v306_v56  ;;  %2539 = vmatprep.subr.mxu0 %v1483_v55 }
  0x3e   : > { %2389 = vmatmul.mubr.msk.f32.gmra.mxu1 %vm354_vm1, %v337_v1  ;;  %2540 = vmatpush3.msra.mxu0 %v1483_v55  ;;  %v1481_v1 = vld [vmem:[%s3637_s5 + $0x48] sm:$0xff] }
  0x3f   : > { %2391 = vmatprep.mubr.msk.f32.mxu1 %vm354_vm1, %v338_v2 }
  0x40   : > { %2344 = vmatmul.mubr.msk.f32.gmra.mxu0 %vm354_vm1, %v307_v59 }
  0x41   : > { %2346 = vmatprep.mubr.msk.f32.mxu0 %vm354_vm1, %v308_v60  ;;  %v1482_v60 = vld [vmem:[%s3637_s5 + $0x50] sm:$0xff] }
  0x42   : > { %2392 = vmatmul.mubr.msk.f32.gmra.mxu1 %vm354_vm1, %v339_v5  ;;  %2541 = vmatprep.subr.mxu0 %v1482_v60  ;;  %v1480_v5 = vld [vmem:[%s3637_s5 + $0x40] sm:$0xff] }
  0x43   : > { %2394 = vmatprep.mubr.msk.f32.mxu1 %vm354_vm1, %v340_v6  ;;  %2542 = vmatpush3.msra.mxu0 %v1482_v60 }
  0x44   : > { %2347 = vmatmul.mubr.msk.f32.gmra.mxu0 %vm354_vm1, %v309_v63  ;;  %2543 = vmatprep.subr.mxu0 %v1481_v1 }
  0x45   : > { %2349 = vmatprep.mubr.msk.f32.mxu0 %vm354_vm1, %v310_v0  ;;  %2544 = vmatpush3.msra.mxu0 %v1481_v1 }
  0x46   : > { %2395 = vmatmul.mubr.msk.f32.gmra.mxu1 %vm354_vm1, %v341_v8  ;;  %2545 = vmatprep.subr.mxu0 %v1480_v5 }
  0x47   : > { %2397 = vmatprep.mubr.msk.f32.mxu1 %vm354_vm1, %v342_v9  ;;  %2546 = vmatpush3.msra.mxu0 %v1480_v5 }
  0x48   : > { %2350 = vmatmul.mubr.msk.f32.gmra.mxu0 %vm354_vm1, %v311_v3 }
  0x49   : > { %2352 = vmatprep.mubr.msk.f32.mxu0 %vm354_vm1, %v312_v4 }
  0x4a   : > { %2398 = vmatmul.mubr.msk.f32.gmra.mxu1 %vm354_vm1, %v343_v10  ;;  %v1479_v10 = vld [vmem:[%s3637_s5 + $0x38] sm:$0xff] }
  0x4b   : > { %2400 = vmatprep.mubr.msk.f32.mxu1 %vm354_vm1, %v344_v11  ;;  %2547 = vmatprep.subr.mxu0 %v1479_v10 }
  0x4c   : > { %2353 = vmatmul.mubr.msk.f32.gmra.mxu0 %vm354_vm1, %v313_v7 }
  0x4d   : > { %2548 = vmatpush3.msra.mxu0 %v1479_v10 }
  0x4e   : > { %2401 = vmatmul.mubr.msk.f32.gmra.mxu1 %vm354_vm1, %v345_v12  ;;  %2549 = vmatprep.subr.mxu0 %v1478_v14 }
  0x4f   : > { %2550 = vmatpush3.msra.mxu0 %v1478_v14 }
  0xd0   : > { %v2309_v18 = vpop.f32.mrf.mxu0 }
  0xd1   : > { %v623_v19 = vadd.f32 %v2309_v18, %v3173_v17 }
  0xd2   : > { %v617_v20 = vpop.f32.mrf.mxu0  ;;  %v3180_v29 = vpop.f32.mrf.mxu1 }
  0xd3   : > { %v618_v21 = vadd.f32 %v3173_v17, %v617_v20  ;;  %v1477_v20 = vld [vmem:[%s3637_s5 + $0x28] sm:$0xff] }
  0xd4   : > { %v2312_v22 = vpop.f32.mrf.mxu0  ;;  %v3183_v32 = vpop.f32.mrf.mxu1  ;;  %2551 = vmatprep.subr.mxu0 %v1477_v20 }
  0xd5   : > { %2669 = vtanh.f32 %v618_v21  ;;  %v633_v23 = vadd.f32 %v2312_v22, %v3173_v17  ;;  %2552 = vmatpush3.msra.mxu0 %v1477_v20 }
  0xd6   : > { %2671 = vtanh.f32 %v623_v19  ;;  %v627_v24 = vpop.f32.mrf.mxu0  ;;  %v3186_v35 = vpop.f32.mrf.mxu1 }
  0xd7   : > { %v628_v25 = vadd.f32 %v3173_v17, %v627_v24  ;;  %v1476_v24 = vld [vmem:[%s3637_s5 + $0x20] sm:$0xff] }
  0xd8   : > { %v2315_v26 = vpop.f32.mrf.mxu0  ;;  %v3189_v38 = vpop.f32.mrf.mxu1  ;;  %2553 = vmatprep.subr.mxu0 %v1476_v24 }
  0xd9   : > { %2673 = vtanh.f32 %v628_v25  ;;  %v643_v27 = vadd.f32 %v2315_v26, %v3173_v17  ;;  %2554 = vmatpush3.msra.mxu0 %v1476_v24 }
  0xda   : > { %2675 = vtanh.f32 %v633_v23  ;;  %v637_v28 = vpop.f32.mrf.mxu0  ;;  %v3198_v44 = vpop.f32.mrf.mxu1 }
  0xdb   : > { %v638_v30 = vadd.f32 %v3173_v17, %v637_v28 }
  0xdc   : > { %v2318_v31 = vpop.f32.mrf.mxu0  ;;  %v3204_v49 = vpop.f32.mrf.mxu1 }
  0xdd   : > { %2677 = vtanh.f32 %v638_v30  ;;  %v653_v33 = vadd.f32 %v2318_v31, %v3173_v17 }
  0xde   : > { %2679 = vtanh.f32 %v643_v27  ;;  %v647_v34 = vpop.f32.mrf.mxu0  ;;  %v3210_v54 = vpop.f32.mrf.mxu1 }
  0xdf   : > { %v648_v36 = vadd.f32 %v3173_v17, %v647_v34 }
  0xe0   : > { %v2321_v37 = vpop.f32.mrf.mxu0  ;;  %v3216_v59 = vpop.f32.mrf.mxu1 }
  0xe1   : > { %2681 = vtanh.f32 %v648_v36  ;;  %v663_v42 = vadd.f32 %v2321_v37, %v3173_v17 }
  0xe2   : > { %v2670_v41 = vpop.eup %2669  ;;  %2683 = vtanh.f32 %v653_v33  ;;  %v657_v43 = vpop.f32.mrf.mxu0 }
  0xe3   : > { %v2672_v46 = vpop.eup %2671  ;;  %v658_v47 = vadd.f32 %v3173_v17, %v657_v43  ;;  %2435 = vmatprep.mubr.f32.mxu1 %v2670_v41  ;;  %v3222_v0 = vpop.f32.mrf.mxu1 }
  0xe4   : > { %v2324_v48 = vpop.f32.mrf.mxu0  ;;  %2436 = vmatmul.mubr.f32.vlgmr.msra.gmra.mxu1 %v2672_v46 }
  0xe5   : > { %2685 = vtanh.f32 %v658_v47  ;;  %v673_v52 = vadd.f32 %v2324_v48, %v3173_v17  ;;  %v3232_v9 = vpop.f32.mrf.mxu1 }
  0xe6   : > { %v2674_v51 = vpop.eup %2673  ;;  %2687 = vtanh.f32 %v663_v42  ;;  %v667_v53 = vpop.f32.mrf.mxu0 }
  0xe7   : > { %v2676_v56 = vpop.eup %2675  ;;  %v668_v57 = vadd.f32 %v3173_v17, %v667_v53  ;;  %2438 = vmatprep.mubr.f32.mxu1 %v2674_v51  ;;  %v3242_v19 = vpop.f32.mrf.mxu1 }
  0xe8   : > { %v2327_v58 = vpop.f32.mrf.mxu0  ;;  %2439 = vmatmul.mubr.f32.gmra.mxu1 %v2676_v56 }
  0xe9   : > { %2689 = vtanh.f32 %v668_v57  ;;  %v683_v62 = vadd.f32 %v2327_v58, %v3173_v17  ;;  %v3252_v28 = vpop.f32.mrf.mxu1 }
  0xea   : > { %v2678_v61 = vpop.eup %2677  ;;  %2691 = vtanh.f32 %v673_v52  ;;  %v677_v63 = vpop.f32.mrf.mxu0 }
  0xeb   : > { %v2680_v2 = vpop.eup %2679  ;;  %v678_v3 = vadd.f32 %v3173_v17, %v677_v63  ;;  %2441 = vmatprep.mubr.f32.mxu1 %v2678_v61  ;;  %v3256_v39 = vpop.f32.mrf.mxu1 }
  0xec   : > { %v2330_v4 = vpop.f32.mrf.mxu0  ;;  %2442 = vmatmul.mubr.f32.gmra.mxu1 %v2680_v2 }
  0xed   : > { %2693 = vtanh.f32 %v678_v3  ;;  %v693_v7 = vadd.f32 %v2330_v4, %v3173_v17  ;;  %v3260_v47 = vpop.f32.mrf.mxu1 }
  0xee   : > { %v2682_v6 = vpop.eup %2681  ;;  %2695 = vtanh.f32 %v683_v62  ;;  %v687_v8 = vpop.f32.mrf.mxu0 }
  0xef   : > { %v2684_v11 = vpop.eup %2683  ;;  %v688_v12 = vadd.f32 %v3173_v17, %v687_v8  ;;  %2444 = vmatprep.mubr.f32.mxu1 %v2682_v6  ;;  %v3264_v56 = vpop.f32.mrf.mxu1 }
  0xf0   : > { %v2333_v13 = vpop.f32.mrf.mxu0  ;;  %2445 = vmatmul.mubr.f32.gmra.mxu1 %v2684_v11 }
  0xf1   : > { %2697 = vtanh.f32 %v688_v12  ;;  %v703_v16 = vadd.f32 %v2333_v13, %v3173_v17  ;;  %v3268_v1 = vpop.f32.mrf.mxu1  ;;  %v778_v13 = vadd.f32 %v3173_v17, %v3183_v32  ;;  %v783_v32 = vadd.f32 %v3180_v29, %v3173_v17 }
  0xf2   : > { %v2686_v15 = vpop.eup %2685  ;;  %2699 = vtanh.f32 %v693_v7  ;;  %v697_v18 = vpop.f32.mrf.mxu0  ;;  %v808_v29 = vadd.f32 %v3173_v17, %v3216_v59  ;;  %v813_v59 = vadd.f32 %v3210_v54, %v3173_v17  ;;  %v838_v54 = vadd.f32 %v3173_v17, %v3260_v47 }
  0xf3   : > { %v2688_v21 = vpop.eup %2687  ;;  %v698_v22 = vadd.f32 %v3173_v17, %v697_v18  ;;  %2447 = vmatprep.mubr.f32.mxu1 %v2686_v15  ;;  %v3272_v8 = vpop.f32.mrf.mxu1  ;;  %v843_v47 = vadd.f32 %v3256_v39, %v3173_v17  ;;  %v853_v39 = vadd.f32 %v3264_v56, %v3173_v17 }
  0xf4   : > { %v2336_v23 = vpop.f32.mrf.mxu0  ;;  %2448 = vmatmul.mubr.f32.gmra.mxu1 %v2688_v21 }
  0xf5   : > { %2701 = vtanh.f32 %v698_v22  ;;  %v713_v26 = vadd.f32 %v2336_v23, %v3173_v17  ;;  %v3278_v18 = vpop.f32.mrf.mxu1  ;;  %v788_v22 = vadd.f32 %v3173_v17, %v3189_v38 }
  0xf6   : > { %v2690_v25 = vpop.eup %2689  ;;  %2703 = vtanh.f32 %v703_v16  ;;  %v707_v27 = vpop.f32.mrf.mxu0 }
  0xf7   : > { %v2692_v30 = vpop.eup %2691  ;;  %v708_v31 = vadd.f32 %v3173_v17, %v707_v27  ;;  %2450 = vmatprep.mubr.f32.mxu1 %v2690_v25  ;;  %v3285_v24 = vpop.f32.mrf.mxu1 }
  0xf8   : > { %v2339_v33 = vpop.f32.mrf.mxu0  ;;  %2451 = vmatmul.mubr.f32.gmra.mxu1 %v2692_v30  ;;  %v793_v30 = vadd.f32 %v3186_v35, %v3173_v17 }
  0xf9   : > { %2705 = vtanh.f32 %v708_v31  ;;  %v723_v36 = vadd.f32 %v2339_v33, %v3173_v17  ;;  %v3291_v38 = vpop.f32.mrf.mxu1 }
  0xfa   : > { %v2694_v34 = vpop.eup %2693  ;;  %2707 = vtanh.f32 %v713_v26  ;;  %v717_v37 = vpop.f32.mrf.mxu0  ;;  %v798_v26 = vadd.f32 %v3173_v17, %v3204_v49 }
  0xfb   : > { %v2696_v40 = vpop.eup %2695  ;;  %v718_v41 = vadd.f32 %v3173_v17, %v717_v37  ;;  %2453 = vmatprep.mubr.f32.mxu1 %v2694_v34  ;;  %v803_v34 = vadd.f32 %v3198_v44, %v3173_v17  ;;  %v3297_v49 = vpop.f32.mrf.mxu1  ;;  %v818_v37 = vadd.f32 %v3173_v17, %v3232_v9  ;;  %v828_v44 = vadd.f32 %v3173_v17, %v3252_v28 }
  0xfc   : > { %v2342_v42 = vpop.f32.mrf.mxu0  ;;  %2454 = vmatmul.mubr.f32.gmra.mxu1 %v2696_v40 }
  0xfd   : > { %2709 = vtanh.f32 %v718_v41  ;;  %v733_v45 = vadd.f32 %v2342_v42, %v3173_v17  ;;  %v877_v41 = vpop.f32.mrf.mxu1 }
  0xfe   : > { %v2698_v43 = vpop.eup %2697  ;;  %2711 = vtanh.f32 %v723_v36  ;;  %v727_v46 = vpop.f32.mrf.mxu0 }
  0xff   : > { %v2700_v48 = vpop.eup %2699  ;;  %v728_v50 = vadd.f32 %v3173_v17, %v727_v46  ;;  %2456 = vmatprep.mubr.f32.mxu1 %v2698_v43  ;;  %v3307_v9 = vpop.f32.mrf.mxu1 }
 0x100   : > { %v2345_v51 = vpop.f32.mrf.mxu0  ;;  %2457 = vmatmul.mubr.f32.gmra.mxu1 %v2700_v48 }
 0x101   : > { %2713 = vtanh.f32 %v728_v50  ;;  %v743_v53 = vadd.f32 %v2345_v51, %v3173_v17  ;;  %v833_v50 = vadd.f32 %v3242_v19, %v3173_v17  ;;  %v887_v28 = vpop.f32.mrf.mxu1 }
 0x102   : > { %v2702_v52 = vpop.eup %2701  ;;  %2715 = vtanh.f32 %v733_v45  ;;  %v737_v55 = vpop.f32.mrf.mxu0  ;;  %v823_v45 = vadd.f32 %v3222_v0, %v3173_v17  ;;  %v848_v0 = vadd.f32 %v3173_v17, %v3268_v1  ;;  %v1473_v1 = vld [vmem:[%s3637_s5 + $0x8] sm:$0xff] }
 0x103   : > { %v2704_v57 = vpop.eup %2703  ;;  %v738_v58 = vadd.f32 %v3173_v17, %v737_v55  ;;  %2459 = vmatprep.mubr.f32.mxu1 %v2702_v52  ;;  %v1475_v52 = vld [vmem:[%s3637_s5 + $0x18] sm:$0xff]  ;;  %v3320_v55 = vpop.f32.mrf.mxu1 }
 0x104   : > { %v2348_v60 = vpop.f32.mrf.mxu0  ;;  %2460 = vmatmul.mubr.f32.gmra.mxu1 %v2704_v57  ;;  %2555 = vmatprep.subr.mxu0 %v1475_v52  ;;  %v858_v57 = vadd.f32 %v3173_v17, %v3278_v18 }
 0x105   : > { %2717 = vtanh.f32 %v738_v58  ;;  %v753_v62 = vadd.f32 %v2348_v60, %v3173_v17  ;;  %2556 = vmatpush3.msra.mxu0 %v1475_v52  ;;  %v1474_v58 = vld [vmem:[%s3637_s5 + $0x10] sm:$0xff] }
 0x106   : > { %v2706_v61 = vpop.eup %2705  ;;  %2719 = vtanh.f32 %v743_v53  ;;  %v747_v63 = vpop.f32.mrf.mxu0  ;;  %2557 = vmatprep.subr.mxu0 %v1474_v58 }
 0x107   : > { %v2708_v2 = vpop.eup %2707  ;;  %v748_v3 = vadd.f32 %v3173_v17, %v747_v63  ;;  %2462 = vmatprep.mubr.f32.mxu1 %v2706_v61  ;;  %v897_v61 = vpop.f32.mrf.mxu1  ;;  %2558 = vmatpush3.msra.mxu0 %v1474_v58  ;;  %v868_v63 = vadd.f32 %v3173_v17, %v3291_v38 }
 0x108   : > { %v2351_v4 = vpop.f32.mrf.mxu0  ;;  %2463 = vmatmul.mubr.f32.gmra.mxu1 %v2708_v2  ;;  %2559 = vmatprep.subr.mxu0 %v1473_v1  ;;  %v898_v18 = vadd.f32 %v3173_v17, %v897_v61 }
 0x109   : > { %2721 = vtanh.f32 %v748_v3  ;;  %v763_v6 = vadd.f32 %v2351_v4, %v3173_v17  ;;  %v863_v3 = vadd.f32 %v3272_v8, %v3173_v17  ;;  %v2396_v56 = vpop.f32.mrf.mxu1  ;;  %2560 = vmatpush3.msra.mxu0 %v1473_v1 }
 0x10a   : > { %v2710_v5 = vpop.eup %2709  ;;  %2723 = vtanh.f32 %v753_v62  ;;  %v757_v7 = vpop.f32.mrf.mxu0 }
 0x10b   : > { %v2712_v10 = vpop.eup %2711  ;;  %v758_v11 = vadd.f32 %v3173_v17, %v757_v7  ;;  %2465 = vmatprep.mubr.f32.mxu1 %v2710_v5  ;;  %v878_v5 = vadd.f32 %v3173_v17, %v877_v41 }
 0x10c   : > { %v2354_v12 = vpop.f32.mrf.mxu0  ;;  %2466 = vmatmul.mubr.f32.gmra.mxu1 %v2712_v10  ;;  %v873_v10 = vadd.f32 %v3285_v24, %v3173_v17 }
 0x10d   : > { %2725 = vtanh.f32 %v758_v11  ;;  %v773_v15 = vadd.f32 %v2354_v12, %v3173_v17  ;;  %v907_v11 = vpop.f32.mrf.mxu1  ;;  %v888_v12 = vadd.f32 %v3173_v17, %v887_v28 }
 0x10e   : > { %v2714_v14 = vpop.eup %2713  ;;  %2727 = vtanh.f32 %v763_v6  ;;  %v767_v16 = vpop.f32.mrf.mxu0  ;;  %v1472_v6 = vld [vmem:[%s3637_s5] sm:$0xff] }
 0x10f   : > { %v2716_v20 = vpop.eup %2715  ;;  %v768_v21 = vadd.f32 %v3173_v17, %v767_v16  ;;  %2468 = vmatprep.mubr.f32.mxu1 %v2714_v14  ;;  %2729 = vtanh.f32 %v778_v13  ;;  %2561 = vmatprep.subr.mxu0 %v1472_v6  ;;  %v883_v14 = vadd.f32 %v3297_v49, %v3173_v17 }
 0x110   : > { %2469 = vmatmul.mubr.f32.gmra.mxu1 %v2716_v20  ;;  %2562 = vmatpush3.msra.mxu0 %v1472_v6 }
 0x111   : > { %2731 = vtanh.f32 %v768_v21  ;;  %v893_v21 = vadd.f32 %v3307_v9, %v3173_v17 }
 0x112   : > { %v2718_v23 = vpop.eup %2717  ;;  %2733 = vtanh.f32 %v773_v15  ;;  %v2399_v15 = vpop.f32.mrf.mxu1 }
 0x113   : > { %v2720_v25 = vpop.eup %2719  ;;  %2471 = vmatprep.mubr.f32.mxu1 %v2718_v23  ;;  %2735 = vtanh.f32 %v788_v22 }
 0x114   : > { %2472 = vmatmul.mubr.f32.gmra.mxu1 %v2720_v25  ;;  %2737 = vtanh.f32 %v783_v32  ;;  %v917_v22 = vpop.f32.mrf.mxu1  ;;  %v908_v32 = vadd.f32 %v3173_v17, %v907_v11  ;;  %v903_v25 = vadd.f32 %v3320_v55, %v3173_v17 }
 0x115   : > { %2739 = vtanh.f32 %v798_v26 }
 0x116   : > { %v2722_v27 = vpop.eup %2721  ;;  %2741 = vtanh.f32 %v793_v30  ;;  %v2402_v26 = vpop.f32.mrf.mxu1  ;;  %v918_v30 = vadd.f32 %v3173_v17, %v917_v22 }
 0x117   : > { %v2724_v31 = vpop.eup %2723  ;;  %2474 = vmatprep.mubr.f32.mxu1 %v2722_v27  ;;  %2743 = vtanh.f32 %v808_v29 }
 0x118   : > { %2475 = vmatmul.mubr.f32.gmra.mxu1 %v2724_v31  ;;  %2745 = vtanh.f32 %v803_v34  ;;  %v913_v31 = vadd.f32 %v2396_v56, %v3173_v17  ;;  %v927_v29 = vpop.f32.mrf.mxu1 }
 0x119   : > { %2747 = vtanh.f32 %v818_v37  ;;  %v928_v34 = vadd.f32 %v3173_v17, %v927_v29 }
 0x11a   : > { %v2726_v33 = vpop.eup %2725  ;;  %2749 = vtanh.f32 %v813_v59 }
 0x11b   : > { %v2728_v36 = vpop.eup %2727  ;;  %2477 = vmatprep.mubr.f32.mxu1 %v2726_v33  ;;  %2751 = vtanh.f32 %v828_v44 }
 0x11c   : > { %2478 = vmatmul.mubr.f32.gmra.mxu1 %v2728_v36  ;;  %v2730_v35 = vpop.eup %2729  ;;  %2753 = vtanh.f32 %v823_v45  ;;  %v923_v36 = vadd.f32 %v2399_v15, %v3173_v17 }
 0x11d   : > { %2755 = vtanh.f32 %v838_v54 }
 0x11e   : > { %v2732_v40 = vpop.eup %2731  ;;  %2757 = vtanh.f32 %v833_v50 }
 0x11f   : > { %v2734_v42 = vpop.eup %2733  ;;  %2480 = vmatprep.mubr.f32.mxu1 %v2732_v40  ;;  %2759 = vtanh.f32 %v848_v0  ;;  %v933_v40 = vadd.f32 %v2402_v26, %v3173_v17  ;;  %v3359_v17 = vld [vmem:[%s3636_s4] ss:$0 sm:$0xff] }
 0x120   : > { %2481 = vmatmul.mubr.f32.gmra.mxu1 %v2734_v42  ;;  %v2736_v43 = vpop.eup %2735  ;;  %2761 = vtanh.f32 %v843_v47 }
 0x121   : > { %2483 = vmatprep.mubr.f32.mxu1 %v2730_v35  ;;  %v2738_v46 = vpop.eup %2737  ;;  %2763 = vtanh.f32 %v858_v57 }
 0x122   : > { %v2740_v48 = vpop.eup %2739  ;;  %2765 = vtanh.f32 %v853_v39 }
 0x123   : > { %v2742_v51 = vpop.eup %2741  ;;  %2767 = vtanh.f32 %v868_v63 }
 0x124   : > { %2484 = vmatmul.mubr.f32.gmra.mxu1 %v2738_v46  ;;  %v2744_v53 = vpop.eup %2743  ;;  %2769 = vtanh.f32 %v863_v3 }
 0x125   : > { %2486 = vmatprep.mubr.f32.mxu1 %v2736_v43  ;;  %v2746_v19 = vpop.eup %2745  ;;  %2771 = vtanh.f32 %v878_v5 }
 0x126   : > { %v2748_v60 = vpop.eup %2747  ;;  %2773 = vtanh.f32 %v873_v10 }
 0x127   : > { %v2750_v62 = vpop.eup %2749  ;;  %2775 = vtanh.f32 %v888_v12 }
 0x128   : > { %2487 = vmatmul.mubr.f32.gmra.mxu1 %v2742_v51  ;;  %v2752_v2 = vpop.eup %2751  ;;  %2777 = vtanh.f32 %v883_v14 }
 0x129   : > { %2489 = vmatprep.mubr.f32.mxu1 %v2740_v48  ;;  %v2754_v4 = vpop.eup %2753  ;;  %2779 = vtanh.f32 %v898_v18 }
 0x12a   : > { %v2756_v7 = vpop.eup %2755  ;;  %2781 = vtanh.f32 %v893_v21 }
 0x12b   : > { %v2758_v8 = vpop.eup %2757  ;;  %2783 = vtanh.f32 %v908_v32 }
 0x12c   : > { %2490 = vmatmul.mubr.f32.gmra.mxu1 %v2746_v19  ;;  %v2760_v13 = vpop.eup %2759  ;;  %2785 = vtanh.f32 %v903_v25 }
 0x12d   : > { %2492 = vmatprep.mubr.f32.mxu1 %v2744_v53  ;;  %v2762_v16 = vpop.eup %2761  ;;  %2787 = vtanh.f32 %v918_v30 }
 0x12e   : > { %v2764_v20 = vpop.eup %2763  ;;  %2789 = vtanh.f32 %v913_v31 }
 0x12f   : > { %v2766_v23 = vpop.eup %2765  ;;  %2791 = vtanh.f32 %v928_v34 }
 0x130   : > { %2493 = vmatmul.mubr.f32.gmra.mxu1 %v2750_v62  ;;  %v2768_v24 = vpop.eup %2767  ;;  %2793 = vtanh.f32 %v923_v36 }
 0x131   : > { %2495 = vmatprep.mubr.f32.mxu1 %v2748_v60  ;;  %v2770_v27 = vpop.eup %2769  ;;  %2795 = vtanh.f32 %v933_v40 }
 0x132   : > { %v2772_v38 = vpop.eup %2771 }
 0x133   : > { %v2774_v33 = vpop.eup %2773 }
 0x134   : > { %2496 = vmatmul.mubr.f32.gmra.mxu1 %v2754_v4  ;;  %v2776_v49 = vpop.eup %2775 }
 0x135   : > { %2498 = vmatprep.mubr.f32.mxu1 %v2752_v2  ;;  %v2778_v35 = vpop.eup %2777 }
 0x136   : > { %v2780_v37 = vpop.eup %2779 }
 0x137   : > { %v2782_v59 = vpop.eup %2781 }
 0x138   : > { %2499 = vmatmul.mubr.f32.gmra.mxu1 %v2758_v8  ;;  %v2784_v41 = vpop.eup %2783 }
 0x139   : > { %2501 = vmatprep.mubr.f32.mxu1 %v2756_v7  ;;  %v2786_v42 = vpop.eup %2785 }
 0x13a   : > { %v2788_v44 = vpop.eup %2787 }
 0x13b   : > { %v2790_v43 = vpop.eup %2789 }
 0x13c   : > { %2502 = vmatmul.mubr.f32.gmra.mxu1 %v2762_v16  ;;  %v2792_v45 = vpop.eup %2791 }
 0x13d   : > { %2504 = vmatprep.mubr.f32.mxu1 %v2760_v13  ;;  %v2794_v9 = vpop.eup %2793 }
 0x13e   : > { %v2796_v46 = vpop.eup %2795 }
 0x140   : > { %2505 = vmatmul.mubr.f32.gmra.mxu1 %v2766_v23 }
 0x141   : > { %2507 = vmatprep.mubr.f32.mxu1 %v2764_v20 }
 0x144   : > { %2508 = vmatmul.mubr.f32.gmra.mxu1 %v2770_v27 }
 0x145   : > { %2510 = vmatprep.mubr.f32.mxu1 %v2768_v24 }
 0x148   : > { %2511 = vmatmul.mubr.f32.gmra.mxu1 %v2774_v33 }
 0x149   : > { %2513 = vmatprep.mubr.f32.mxu1 %v2772_v38 }
 0x14c   : > { %2514 = vmatmul.mubr.f32.gmra.mxu1 %v2778_v35 }
 0x14d   : > { %2516 = vmatprep.mubr.f32.mxu1 %v2776_v49 }
 0x150   : > { %2517 = vmatmul.mubr.f32.gmra.mxu1 %v2782_v59 }
 0x151   : > { %2519 = vmatprep.mubr.f32.mxu1 %v2780_v37 }
 0x154   : > { %2520 = vmatmul.mubr.f32.gmra.mxu1 %v2786_v42 }
 0x155   : > { %2522 = vmatprep.mubr.f32.mxu1 %v2784_v41 }
 0x158   : > { %2523 = vmatmul.mubr.f32.gmra.mxu1 %v2790_v43 }
 0x159   : > { %2525 = vmatprep.mubr.f32.mxu1 %v2788_v44 }
 0x15c   : > { %2526 = vmatmul.mubr.f32.gmra.mxu1 %v2794_v9 }
 0x15d   : > { %2528 = vmatprep.mubr.f32.mxu1 %v2792_v45 }
 0x160   : > { %2529 = vmatmul.mubr.f32.gmra.mxu1 %v2796_v46 }
 0x1a4   : > { %v2437_v54 = vpop.f32.mrf.mxu1 }
 0x1a5   : > { %v1095_v48 = vadd.f32 %v2437_v54, %v3359_v17 }
 0x1a6   : > { %v1089_v50 = vpop.f32.mrf.mxu1 }
 0x1a7   : > { %v1090_v28 = vadd.f32 %v3359_v17, %v1089_v50 }
 0x1a8   : > { %v2440_v51 = vpop.f32.mrf.mxu1 }
 0x1a9   : > { %2797 = vtanh.f32 %v1090_v28  ;;  %v1105_v0 = vadd.f32 %v2440_v51, %v3359_v17 }
 0x1aa   : > { %2799 = vtanh.f32 %v1095_v48  ;;  %v1099_v52 = vpop.f32.mrf.mxu1 }
 0x1ab   : > { %v1100_v53 = vadd.f32 %v3359_v17, %v1099_v52 }
 0x1ac   : > { %v2443_v47 = vpop.f32.mrf.mxu1 }
 0x1ad   : > { %2801 = vtanh.f32 %v1100_v53  ;;  %v1115_v55 = vadd.f32 %v2443_v47, %v3359_v17 }
 0x1ae   : > { %2803 = vtanh.f32 %v1105_v0  ;;  %v1109_v19 = vpop.f32.mrf.mxu1 }
 0x1af   : > { %v1110_v57 = vadd.f32 %v3359_v17, %v1109_v19 }
 0x1b0   : > { %v2446_v58 = vpop.f32.mrf.mxu1 }
 0x1b1   : > { %2805 = vtanh.f32 %v1110_v57  ;;  %v1125_v60 = vadd.f32 %v2446_v58, %v3359_v17 }
 0x1b2   : > { %2807 = vtanh.f32 %v1115_v55  ;;  %v1119_v39 = vpop.f32.mrf.mxu1 }
 0x1b3   : > { %v1120_v61 = vadd.f32 %v3359_v17, %v1119_v39 }
 0x1b4   : > { %v2449_v62 = vpop.f32.mrf.mxu1 }
 0x1b5   : > { %2809 = vtanh.f32 %v1120_v61  ;;  %v1135_v1 = vadd.f32 %v2449_v62, %v3359_v17 }
 0x1b6   : > { %v2798_v63 = vpop.eup %2797  ;;  %2811 = vtanh.f32 %v1125_v60  ;;  %v1129_v2 = vpop.f32.mrf.mxu1 }
 0x1b7   : > { %v2800_v3 = vpop.eup %2799  ;;  %v1130_v56 = vadd.f32 %v3359_v17, %v1129_v2  ;;  %2563 = vmatprep.mubr.f32.mxu0 %v2798_v63 }
 0x1b8   : > { %v2452_v4 = vpop.f32.mrf.mxu1  ;;  %2564 = vmatmul.mubr.f32.vlgmr.msra.gmra.mxu0 %v2800_v3 }
 0x1b9   : > { %2813 = vtanh.f32 %v1130_v56  ;;  %v1145_v6 = vadd.f32 %v2452_v4, %v3359_v17 }
 0x1ba   : > { %v2802_v5 = vpop.eup %2801  ;;  %2815 = vtanh.f32 %v1135_v1  ;;  %v1139_v7 = vpop.f32.mrf.mxu1 }
 0x1bb   : > { %v2804_v10 = vpop.eup %2803  ;;  %v1140_v11 = vadd.f32 %v3359_v17, %v1139_v7  ;;  %2566 = vmatprep.mubr.f32.mxu0 %v2802_v5 }
 0x1bc   : > { %v2455_v8 = vpop.f32.mrf.mxu1  ;;  %2567 = vmatmul.mubr.f32.gmra.mxu0 %v2804_v10 }
 0x1bd   : > { %2817 = vtanh.f32 %v1140_v11  ;;  %v1155_v13 = vadd.f32 %v2455_v8, %v3359_v17 }
 0x1be   : > { %v2806_v12 = vpop.eup %2805  ;;  %2819 = vtanh.f32 %v1145_v6  ;;  %v1149_v14 = vpop.f32.mrf.mxu1 }
 0x1bf   : > { %v2808_v15 = vpop.eup %2807  ;;  %v1150_v16 = vadd.f32 %v3359_v17, %v1149_v14  ;;  %2569 = vmatprep.mubr.f32.mxu0 %v2806_v12 }
 0x1c0   : > { %v2458_v18 = vpop.f32.mrf.mxu1  ;;  %2570 = vmatmul.mubr.f32.gmra.mxu0 %v2808_v15 }
 0x1c1   : > { %2821 = vtanh.f32 %v1150_v16  ;;  %v1165_v21 = vadd.f32 %v2458_v18, %v3359_v17 }
 0x1c2   : > { %v2810_v20 = vpop.eup %2809  ;;  %2823 = vtanh.f32 %v1155_v13  ;;  %v1159_v22 = vpop.f32.mrf.mxu1 }
 0x1c3   : > { %v2812_v23 = vpop.eup %2811  ;;  %v1160_v32 = vadd.f32 %v3359_v17, %v1159_v22  ;;  %2572 = vmatprep.mubr.f32.mxu0 %v2810_v20 }
 0x1c4   : > { %v2461_v24 = vpop.f32.mrf.mxu1  ;;  %2573 = vmatmul.mubr.f32.gmra.mxu0 %v2812_v23 }
 0x1c5   : > { %2825 = vtanh.f32 %v1160_v32  ;;  %v1175_v26 = vadd.f32 %v2461_v24, %v3359_v17 }
 0x1c6   : > { %v2814_v25 = vpop.eup %2813  ;;  %2827 = vtanh.f32 %v1165_v21  ;;  %v1169_v27 = vpop.f32.mrf.mxu1 }
 0x1c7   : > { %v2816_v30 = vpop.eup %2815  ;;  %v1170_v38 = vadd.f32 %v3359_v17, %v1169_v27  ;;  %2575 = vmatprep.mubr.f32.mxu0 %v2814_v25 }
 0x1c8   : > { %v2464_v31 = vpop.f32.mrf.mxu1  ;;  %2576 = vmatmul.mubr.f32.gmra.mxu0 %v2816_v30 }
 0x1c9   : > { %2829 = vtanh.f32 %v1170_v38  ;;  %v1185_v33 = vadd.f32 %v2464_v31, %v3359_v17 }
 0x1ca   : > { %v2818_v29 = vpop.eup %2817  ;;  %2831 = vtanh.f32 %v1175_v26  ;;  %v1179_v34 = vpop.f32.mrf.mxu1 }
 0x1cb   : > { %v2820_v49 = vpop.eup %2819  ;;  %v1180_v36 = vadd.f32 %v3359_v17, %v1179_v34  ;;  %2578 = vmatprep.mubr.f32.mxu0 %v2818_v29 }
 0x1cc   : > { %v2467_v35 = vpop.f32.mrf.mxu1  ;;  %2579 = vmatmul.mubr.f32.gmra.mxu0 %v2820_v49 }
 0x1cd   : > { %2833 = vtanh.f32 %v1180_v36  ;;  %v1195_v40 = vadd.f32 %v2467_v35, %v3359_v17 }
 0x1ce   : > { %v2822_v37 = vpop.eup %2821  ;;  %2835 = vtanh.f32 %v1185_v33  ;;  %v1189_v59 = vpop.f32.mrf.mxu1 }
 0x1cf   : > { %v2824_v41 = vpop.eup %2823  ;;  %v1190_v42 = vadd.f32 %v3359_v17, %v1189_v59  ;;  %2581 = vmatprep.mubr.f32.mxu0 %v2822_v37 }
 0x1d0   : > { %v2470_v44 = vpop.f32.mrf.mxu1  ;;  %2582 = vmatmul.mubr.f32.gmra.mxu0 %v2824_v41 }
 0x1d1   : > { %2837 = vtanh.f32 %v1190_v42  ;;  %v1205_v45 = vadd.f32 %v2470_v44, %v3359_v17 }
 0x1d2   : > { %v2826_v43 = vpop.eup %2825  ;;  %2839 = vtanh.f32 %v1195_v40  ;;  %v1199_v9 = vpop.f32.mrf.mxu1 }
 0x1d3   : > { %v2828_v46 = vpop.eup %2827  ;;  %v1200_v54 = vadd.f32 %v3359_v17, %v1199_v9  ;;  %2584 = vmatprep.mubr.f32.mxu0 %v2826_v43 }
 0x1d4   : > { %v2473_v48 = vpop.f32.mrf.mxu1  ;;  %2585 = vmatmul.mubr.f32.gmra.mxu0 %v2828_v46 }
 0x1d5   : > { %2841 = vtanh.f32 %v1200_v54  ;;  %v1215_v28 = vadd.f32 %v2473_v48, %v3359_v17 }
 0x1d6   : > { %v2830_v50 = vpop.eup %2829  ;;  %2843 = vtanh.f32 %v1205_v45  ;;  %v1209_v51 = vpop.f32.mrf.mxu1 }
 0x1d7   : > { %v2832_v0 = vpop.eup %2831  ;;  %v1210_v52 = vadd.f32 %v3359_v17, %v1209_v51  ;;  %2587 = vmatprep.mubr.f32.mxu0 %v2830_v50 }
 0x1d8   : > { %v2476_v53 = vpop.f32.mrf.mxu1  ;;  %2588 = vmatmul.mubr.f32.gmra.mxu0 %v2832_v0 }
 0x1d9   : > { %2845 = vtanh.f32 %v1210_v52  ;;  %v1225_v55 = vadd.f32 %v2476_v53, %v3359_v17 }
 0x1da   : > { %v2834_v47 = vpop.eup %2833  ;;  %2847 = vtanh.f32 %v1215_v28  ;;  %v1219_v19 = vpop.f32.mrf.mxu1 }
 0x1db   : > { %v2836_v57 = vpop.eup %2835  ;;  %v1220_v58 = vadd.f32 %v3359_v17, %v1219_v19  ;;  %2590 = vmatprep.mubr.f32.mxu0 %v2834_v47 }
 0x1dc   : > { %v2479_v60 = vpop.f32.mrf.mxu1  ;;  %2591 = vmatmul.mubr.f32.gmra.mxu0 %v2836_v57 }
 0x1dd   : > { %2849 = vtanh.f32 %v1220_v58  ;;  %v1235_v61 = vadd.f32 %v2479_v60, %v3359_v17 }
 0x1de   : > { %v2838_v39 = vpop.eup %2837  ;;  %2851 = vtanh.f32 %v1225_v55  ;;  %v1229_v62 = vpop.f32.mrf.mxu1 }
 0x1df   : > { %v2840_v63 = vpop.eup %2839  ;;  %v1230_v1 = vadd.f32 %v3359_v17, %v1229_v62  ;;  %2593 = vmatprep.mubr.f32.mxu0 %v2838_v39 }
 0x1e0   : > { %v2482_v2 = vpop.f32.mrf.mxu1  ;;  %2594 = vmatmul.mubr.f32.gmra.mxu0 %v2840_v63 }
 0x1e1   : > { %2853 = vtanh.f32 %v1230_v1  ;;  %v1245_v56 = vadd.f32 %v2482_v2, %v3359_v17 }
 0x1e2   : > { %v2842_v3 = vpop.eup %2841  ;;  %2855 = vtanh.f32 %v1235_v61  ;;  %v1239_v4 = vpop.f32.mrf.mxu1 }
 0x1e3   : > { %v2844_v5 = vpop.eup %2843  ;;  %v1240_v6 = vadd.f32 %v3359_v17, %v1239_v4  ;;  %2596 = vmatprep.mubr.f32.mxu0 %v2842_v3 }
 0x1e4   : > { %v2485_v7 = vpop.f32.mrf.mxu1  ;;  %2597 = vmatmul.mubr.f32.gmra.mxu0 %v2844_v5 }
 0x1e5   : > { %2857 = vtanh.f32 %v1240_v6  ;;  %v1255_v11 = vadd.f32 %v2485_v7, %v3359_v17 }
 0x1e6   : > { %v2846_v10 = vpop.eup %2845  ;;  %2859 = vtanh.f32 %v1245_v56  ;;  %v1249_v8 = vpop.f32.mrf.mxu1 }
 0x1e7   : > { %v2848_v12 = vpop.eup %2847  ;;  %v1250_v13 = vadd.f32 %v3359_v17, %v1249_v8  ;;  %2599 = vmatprep.mubr.f32.mxu0 %v2846_v10 }
 0x1e8   : > { %v2488_v14 = vpop.f32.mrf.mxu1  ;;  %2600 = vmatmul.mubr.f32.gmra.mxu0 %v2848_v12 }
 0x1e9   : > { %2861 = vtanh.f32 %v1250_v13  ;;  %v1265_v16 = vadd.f32 %v2488_v14, %v3359_v17 }
 0x1ea   : > { %v2850_v15 = vpop.eup %2849  ;;  %2863 = vtanh.f32 %v1255_v11  ;;  %v1259_v18 = vpop.f32.mrf.mxu1 }
 0x1eb   : > { %v2852_v20 = vpop.eup %2851  ;;  %v1260_v21 = vadd.f32 %v3359_v17, %v1259_v18  ;;  %2602 = vmatprep.mubr.f32.mxu0 %v2850_v15 }
 0x1ec   : > { %v2491_v22 = vpop.f32.mrf.mxu1  ;;  %2603 = vmatmul.mubr.f32.gmra.mxu0 %v2852_v20 }
 0x1ed   : > { %2865 = vtanh.f32 %v1260_v21  ;;  %v1275_v32 = vadd.f32 %v2491_v22, %v3359_v17 }
 0x1ee   : > { %v2854_v23 = vpop.eup %2853  ;;  %2867 = vtanh.f32 %v1265_v16  ;;  %v1269_v24 = vpop.f32.mrf.mxu1 }
 0x1ef   : > { %v2856_v25 = vpop.eup %2855  ;;  %v1270_v26 = vadd.f32 %v3359_v17, %v1269_v24  ;;  %2605 = vmatprep.mubr.f32.mxu0 %v2854_v23 }
 0x1f0   : > { %v2494_v27 = vpop.f32.mrf.mxu1  ;;  %2606 = vmatmul.mubr.f32.gmra.mxu0 %v2856_v25 }
 0x1f1   : > { %2869 = vtanh.f32 %v1270_v26  ;;  %v1285_v38 = vadd.f32 %v2494_v27, %v3359_v17 }
 0x1f2   : > { %v2858_v30 = vpop.eup %2857  ;;  %2871 = vtanh.f32 %v1275_v32  ;;  %v1279_v31 = vpop.f32.mrf.mxu1 }
 0x1f3   : > { %v2860_v29 = vpop.eup %2859  ;;  %v1280_v33 = vadd.f32 %v3359_v17, %v1279_v31  ;;  %2608 = vmatprep.mubr.f32.mxu0 %v2858_v30 }
 0x1f4   : > { %v2497_v34 = vpop.f32.mrf.mxu1  ;;  %2609 = vmatmul.mubr.f32.gmra.mxu0 %v2860_v29 }
 0x1f5   : > { %2873 = vtanh.f32 %v1280_v33  ;;  %v1295_v36 = vadd.f32 %v2497_v34, %v3359_v17 }
 0x1f6   : > { %v2862_v49 = vpop.eup %2861  ;;  %2875 = vtanh.f32 %v1285_v38  ;;  %v1289_v35 = vpop.f32.mrf.mxu1 }
 0x1f7   : > { %v2864_v37 = vpop.eup %2863  ;;  %v1290_v40 = vadd.f32 %v3359_v17, %v1289_v35  ;;  %2611 = vmatprep.mubr.f32.mxu0 %v2862_v49 }
 0x1f8   : > { %v2500_v59 = vpop.f32.mrf.mxu1  ;;  %2612 = vmatmul.mubr.f32.gmra.mxu0 %v2864_v37 }
 0x1f9   : > { %2877 = vtanh.f32 %v1290_v40  ;;  %v1305_v42 = vadd.f32 %v2500_v59, %v3359_v17 }
 0x1fa   : > { %v2866_v41 = vpop.eup %2865  ;;  %2879 = vtanh.f32 %v1295_v36  ;;  %v1299_v44 = vpop.f32.mrf.mxu1 }
 0x1fb   : > { %v2868_v43 = vpop.eup %2867  ;;  %v1300_v45 = vadd.f32 %v3359_v17, %v1299_v44  ;;  %2614 = vmatprep.mubr.f32.mxu0 %v2866_v41 }
 0x1fc   : > { %v2503_v9 = vpop.f32.mrf.mxu1  ;;  %2615 = vmatmul.mubr.f32.gmra.mxu0 %v2868_v43 }
 0x1fd   : > { %2881 = vtanh.f32 %v1300_v45  ;;  %v1315_v54 = vadd.f32 %v2503_v9, %v3359_v17 }
 0x1fe   : > { %v2870_v46 = vpop.eup %2869  ;;  %2883 = vtanh.f32 %v1305_v42  ;;  %v1309_v48 = vpop.f32.mrf.mxu1 }
 0x1ff   : > { %v2872_v50 = vpop.eup %2871  ;;  %v1310_v28 = vadd.f32 %v3359_v17, %v1309_v48  ;;  %2617 = vmatprep.mubr.f32.mxu0 %v2870_v46 }
 0x200   : > { %v2506_v51 = vpop.f32.mrf.mxu1  ;;  %2618 = vmatmul.mubr.f32.gmra.mxu0 %v2872_v50 }
 0x201   : > { %2885 = vtanh.f32 %v1310_v28  ;;  %v1325_v52 = vadd.f32 %v2506_v51, %v3359_v17 }
 0x202   : > { %v2874_v0 = vpop.eup %2873  ;;  %2887 = vtanh.f32 %v1315_v54  ;;  %v1319_v53 = vpop.f32.mrf.mxu1 }
 0x203   : > { %v2876_v47 = vpop.eup %2875  ;;  %v1320_v55 = vadd.f32 %v3359_v17, %v1319_v53  ;;  %2620 = vmatprep.mubr.f32.mxu0 %v2874_v0 }
 0x204   : > { %v2509_v19 = vpop.f32.mrf.mxu1  ;;  %2621 = vmatmul.mubr.f32.gmra.mxu0 %v2876_v47 }
 0x205   : > { %2889 = vtanh.f32 %v1320_v55  ;;  %v1335_v58 = vadd.f32 %v2509_v19, %v3359_v17 }
 0x206   : > { %v2878_v57 = vpop.eup %2877  ;;  %2891 = vtanh.f32 %v1325_v52  ;;  %v1329_v60 = vpop.f32.mrf.mxu1 }
 0x207   : > { %v2880_v39 = vpop.eup %2879  ;;  %v1330_v61 = vadd.f32 %v3359_v17, %v1329_v60  ;;  %2623 = vmatprep.mubr.f32.mxu0 %v2878_v57 }
 0x208   : > { %v2512_v62 = vpop.f32.mrf.mxu1  ;;  %2624 = vmatmul.mubr.f32.gmra.mxu0 %v2880_v39 }
 0x209   : > { %2893 = vtanh.f32 %v1330_v61  ;;  %v1345_v1 = vadd.f32 %v2512_v62, %v3359_v17 }
 0x20a   : > { %v2882_v63 = vpop.eup %2881  ;;  %2895 = vtanh.f32 %v1335_v58  ;;  %v1339_v2 = vpop.f32.mrf.mxu1 }
 0x20b   : > { %v2884_v3 = vpop.eup %2883  ;;  %v1340_v56 = vadd.f32 %v3359_v17, %v1339_v2  ;;  %2626 = vmatprep.mubr.f32.mxu0 %v2882_v63 }
 0x20c   : > { %v2515_v4 = vpop.f32.mrf.mxu1  ;;  %2627 = vmatmul.mubr.f32.gmra.mxu0 %v2884_v3 }
 0x20d   : > { %2897 = vtanh.f32 %v1340_v56  ;;  %v1355_v6 = vadd.f32 %v2515_v4, %v3359_v17 }
 0x20e   : > { %v2886_v5 = vpop.eup %2885  ;;  %2899 = vtanh.f32 %v1345_v1  ;;  %v1349_v7 = vpop.f32.mrf.mxu1 }
 0x20f   : > { %v2888_v10 = vpop.eup %2887  ;;  %v1350_v11 = vadd.f32 %v3359_v17, %v1349_v7  ;;  %2629 = vmatprep.mubr.f32.mxu0 %v2886_v5 }
 0x210   : > { %v2518_v8 = vpop.f32.mrf.mxu1  ;;  %2630 = vmatmul.mubr.f32.gmra.mxu0 %v2888_v10 }
 0x211   : > { %2901 = vtanh.f32 %v1350_v11  ;;  %v1365_v13 = vadd.f32 %v2518_v8, %v3359_v17 }
 0x212   : > { %v2890_v12 = vpop.eup %2889  ;;  %2903 = vtanh.f32 %v1355_v6  ;;  %v1359_v14 = vpop.f32.mrf.mxu1 }
 0x213   : > { %v2892_v15 = vpop.eup %2891  ;;  %v1360_v16 = vadd.f32 %v3359_v17, %v1359_v14  ;;  %2632 = vmatprep.mubr.f32.mxu0 %v2890_v12 }
 0x214   : > { %v2521_v18 = vpop.f32.mrf.mxu1  ;;  %2633 = vmatmul.mubr.f32.gmra.mxu0 %v2892_v15 }
 0x215   : > { %2905 = vtanh.f32 %v1360_v16  ;;  %v1375_v21 = vadd.f32 %v2521_v18, %v3359_v17 }
 0x216   : > { %v2894_v20 = vpop.eup %2893  ;;  %2907 = vtanh.f32 %v1365_v13  ;;  %v1369_v22 = vpop.f32.mrf.mxu1 }
 0x217   : > { %v2896_v23 = vpop.eup %2895  ;;  %v1370_v32 = vadd.f32 %v3359_v17, %v1369_v22  ;;  %2635 = vmatprep.mubr.f32.mxu0 %v2894_v20 }
 0x218   : > { %v2524_v24 = vpop.f32.mrf.mxu1  ;;  %2636 = vmatmul.mubr.f32.gmra.mxu0 %v2896_v23 }
 0x219   : > { %2909 = vtanh.f32 %v1370_v32  ;;  %v1385_v26 = vadd.f32 %v2524_v24, %v3359_v17 }
 0x21a   : > { %v2898_v25 = vpop.eup %2897  ;;  %2911 = vtanh.f32 %v1375_v21  ;;  %v1379_v27 = vpop.f32.mrf.mxu1 }
 0x21b   : > { %v2900_v30 = vpop.eup %2899  ;;  %v1380_v38 = vadd.f32 %v3359_v17, %v1379_v27  ;;  %2638 = vmatprep.mubr.f32.mxu0 %v2898_v25 }
 0x21c   : > { %v2527_v31 = vpop.f32.mrf.mxu1  ;;  %2639 = vmatmul.mubr.f32.gmra.mxu0 %v2900_v30 }
 0x21d   : > { %2913 = vtanh.f32 %v1380_v38  ;;  %v1395_v33 = vadd.f32 %v2527_v31, %v3359_v17 }
 0x21e   : > { %v2902_v29 = vpop.eup %2901  ;;  %2915 = vtanh.f32 %v1385_v26  ;;  %v1389_v34 = vpop.f32.mrf.mxu1 }
 0x21f   : > { %v2904_v49 = vpop.eup %2903  ;;  %v1390_v36 = vadd.f32 %v3359_v17, %v1389_v34  ;;  %2641 = vmatprep.mubr.f32.mxu0 %v2902_v29 }
 0x220   : > { %v2530_v35 = vpop.f32.mrf.mxu1  ;;  %2642 = vmatmul.mubr.f32.gmra.mxu0 %v2904_v49 }
 0x221   : > { %2917 = vtanh.f32 %v1390_v36  ;;  %v1405_v40 = vadd.f32 %v2530_v35, %v3359_v17 }
 0x222   : > { %v2906_v37 = vpop.eup %2905  ;;  %2919 = vtanh.f32 %v1395_v33  ;;  %v1399_v59 = vpop.f32.mrf.mxu1 }
 0x223   : > { %v2908_v41 = vpop.eup %2907  ;;  %v1400_v42 = vadd.f32 %v3359_v17, %v1399_v59  ;;  %2644 = vmatprep.mubr.f32.mxu0 %v2906_v37  ;;  %v3428_v17 = vld [vmem:[%s3638_s6] ss:$0 sm:$0xff] }
 0x224   : > { %2645 = vmatmul.mubr.f32.gmra.mxu0 %v2908_v41 }
 0x225   : > { %2921 = vtanh.f32 %v1400_v42 }
 0x226   : > { %v2910_v44 = vpop.eup %2909  ;;  %2923 = vtanh.f32 %v1405_v40 }
 0x227   : > { %v2912_v43 = vpop.eup %2911  ;;  %2647 = vmatprep.mubr.f32.mxu0 %v2910_v44 }
 0x228   : > { %2648 = vmatmul.mubr.f32.gmra.mxu0 %v2912_v43 }
 0x22a   : > { %v2914_v45 = vpop.eup %2913 }
 0x22b   : > { %v2916_v9 = vpop.eup %2915  ;;  %2650 = vmatprep.mubr.f32.mxu0 %v2914_v45 }
 0x22c   : > { %2651 = vmatmul.mubr.f32.gmra.mxu0 %v2916_v9 }
 0x22e   : > { %v2918_v46 = vpop.eup %2917 }
 0x22f   : > { %v2920_v54 = vpop.eup %2919  ;;  %2653 = vmatprep.mubr.f32.mxu0 %v2918_v46 }
 0x230   : > { %2654 = vmatmul.mubr.f32.gmra.mxu0 %v2920_v54 }
 0x232   : > { %v2922_v48 = vpop.eup %2921 }
 0x233   : > { %v2924_v50 = vpop.eup %2923  ;;  %2656 = vmatprep.mubr.f32.mxu0 %v2922_v48 }
 0x234   : > { %2657 = vmatmul.mubr.f32.gmra.mxu0 %v2924_v50 }
 0x278   : > { %v2565_v28 = vpop.f32.mrf.mxu0 }
 0x279   : > { %v1567_v51 = vadd.f32 %v2565_v28, %v3428_v17 }
 0x27a   : > { %v1561_v0 = vpop.f32.mrf.mxu0 }
 0x27b   : > { %1882 = vst.msk [vmem:[%s3435_s22 + $0x8] sm:$0xff] %vm1880_vm2, %v1567_v51  ;;  %v1562_v52 = vadd.f32 %v3428_v17, %v1561_v0 }
 0x27c   : > { %v2568_v53 = vpop.f32.mrf.mxu0 }
 0x27d   : > { %1881 = vst.msk [vmem:[%s3435_s22] sm:$0xff] %vm1880_vm2, %v1562_v52  ;;  %v1577_v47 = vadd.f32 %v2568_v53, %v3428_v17 }
 0x27e   : > { %v1571_v55 = vpop.f32.mrf.mxu0 }
 0x27f   : > { %1884 = vst.msk [vmem:[%s3435_s22 + $0x18] sm:$0xff] %vm1880_vm2, %v1577_v47  ;;  %v1572_v19 = vadd.f32 %v3428_v17, %v1571_v55 }
 0x280   : > { %v2571_v57 = vpop.f32.mrf.mxu0 }
 0x281   : > { %1883 = vst.msk [vmem:[%s3435_s22 + $0x10] sm:$0xff] %vm1880_vm2, %v1572_v19  ;;  %v1587_v58 = vadd.f32 %v2571_v57, %v3428_v17 }
 0x282   : > { %v1581_v60 = vpop.f32.mrf.mxu0 }
 0x283   : > { %1886 = vst.msk [vmem:[%s3435_s22 + $0x28] sm:$0xff] %vm1880_vm2, %v1587_v58  ;;  %v1582_v39 = vadd.f32 %v3428_v17, %v1581_v60 }
 0x284   : > { %v2574_v61 = vpop.f32.mrf.mxu0 }
 0x285   : > { %1885 = vst.msk [vmem:[%s3435_s22 + $0x20] sm:$0xff] %vm1880_vm2, %v1582_v39  ;;  %v1597_v62 = vadd.f32 %v2574_v61, %v3428_v17 }
 0x286   : > { %v1591_v63 = vpop.f32.mrf.mxu0 }
 0x287   : > { %1888 = vst.msk [vmem:[%s3435_s22 + $0x38] sm:$0xff] %vm1880_vm2, %v1597_v62  ;;  %v1592_v1 = vadd.f32 %v3428_v17, %v1591_v63 }
 0x288   : > { %v2577_v2 = vpop.f32.mrf.mxu0 }
 0x289   : > { %1887 = vst.msk [vmem:[%s3435_s22 + $0x30] sm:$0xff] %vm1880_vm2, %v1592_v1  ;;  %v1607_v3 = vadd.f32 %v2577_v2, %v3428_v17 }
 0x28a   : > { %v1601_v56 = vpop.f32.mrf.mxu0 }
 0x28b   : > { %1890 = vst.msk [vmem:[%s3435_s22 + $0x48] sm:$0xff] %vm1880_vm2, %v1607_v3  ;;  %v1602_v4 = vadd.f32 %v3428_v17, %v1601_v56 }
 0x28c   : > { %v2580_v5 = vpop.f32.mrf.mxu0 }
 0x28d   : > { %1889 = vst.msk [vmem:[%s3435_s22 + $0x40] sm:$0xff] %vm1880_vm2, %v1602_v4  ;;  %v1617_v6 = vadd.f32 %v2580_v5, %v3428_v17 }
 0x28e   : > { %v1611_v7 = vpop.f32.mrf.mxu0 }
 0x28f   : > { %1892 = vst.msk [vmem:[%s3435_s22 + $0x58] sm:$0xff] %vm1880_vm2, %v1617_v6  ;;  %v1612_v10 = vadd.f32 %v3428_v17, %v1611_v7 }
 0x290   : > { %v2583_v11 = vpop.f32.mrf.mxu0 }
 0x291   : > { %1891 = vst.msk [vmem:[%s3435_s22 + $0x50] sm:$0xff] %vm1880_vm2, %v1612_v10  ;;  %v1627_v8 = vadd.f32 %v2583_v11, %v3428_v17 }
 0x292   : > { %v1621_v12 = vpop.f32.mrf.mxu0 }
 0x293   : > { %1894 = vst.msk [vmem:[%s3435_s22 + $0x68] sm:$0xff] %vm1880_vm2, %v1627_v8  ;;  %v1622_v13 = vadd.f32 %v3428_v17, %v1621_v12 }
 0x294   : > { %v2586_v14 = vpop.f32.mrf.mxu0 }
 0x295   : > { %1893 = vst.msk [vmem:[%s3435_s22 + $0x60] sm:$0xff] %vm1880_vm2, %v1622_v13  ;;  %v1637_v15 = vadd.f32 %v2586_v14, %v3428_v17 }
 0x296   : > { %v1631_v16 = vpop.f32.mrf.mxu0 }
 0x297   : > { %1896 = vst.msk [vmem:[%s3435_s22 + $0x78] sm:$0xff] %vm1880_vm2, %v1637_v15  ;;  %v1632_v18 = vadd.f32 %v3428_v17, %v1631_v16 }
 0x298   : > { %v2589_v20 = vpop.f32.mrf.mxu0 }
 0x299   : > { %1895 = vst.msk [vmem:[%s3435_s22 + $0x70] sm:$0xff] %vm1880_vm2, %v1632_v18  ;;  %v1647_v21 = vadd.f32 %v2589_v20, %v3428_v17 }
 0x29a   : > { %v1641_v22 = vpop.f32.mrf.mxu0 }
 0x29b   : > { %1898 = vst.msk [vmem:[%s3435_s22 + $0x88] sm:$0xff] %vm1880_vm2, %v1647_v21  ;;  %v1642_v23 = vadd.f32 %v3428_v17, %v1641_v22 }
 0x29c   : > { %v2592_v32 = vpop.f32.mrf.mxu0 }
 0x29d   : > { %1897 = vst.msk [vmem:[%s3435_s22 + $0x80] sm:$0xff] %vm1880_vm2, %v1642_v23  ;;  %v1657_v24 = vadd.f32 %v2592_v32, %v3428_v17 }
 0x29e   : > { %v1651_v25 = vpop.f32.mrf.mxu0 }
 0x29f   : > { %1900 = vst.msk [vmem:[%s3435_s22 + $0x98] sm:$0xff] %vm1880_vm2, %v1657_v24  ;;  %v1652_v26 = vadd.f32 %v3428_v17, %v1651_v25 }
 0x2a0   : > { %v2595_v27 = vpop.f32.mrf.mxu0 }
 0x2a1   : > { %1899 = vst.msk [vmem:[%s3435_s22 + $0x90] sm:$0xff] %vm1880_vm2, %v1652_v26  ;;  %v1667_v30 = vadd.f32 %v2595_v27, %v3428_v17 }
 0x2a2   : > { %v1661_v38 = vpop.f32.mrf.mxu0 }
 0x2a3   : > { %1902 = vst.msk [vmem:[%s3435_s22 + $0xa8] sm:$0xff] %vm1880_vm2, %v1667_v30  ;;  %v1662_v31 = vadd.f32 %v3428_v17, %v1661_v38 }
 0x2a4   : > { %v2598_v29 = vpop.f32.mrf.mxu0 }
 0x2a5   : > { %1901 = vst.msk [vmem:[%s3435_s22 + $0xa0] sm:$0xff] %vm1880_vm2, %v1662_v31  ;;  %v1677_v33 = vadd.f32 %v2598_v29, %v3428_v17 }
 0x2a6   : > { %v1671_v34 = vpop.f32.mrf.mxu0 }
 0x2a7   : > { %1904 = vst.msk [vmem:[%s3435_s22 + $0xb8] sm:$0xff] %vm1880_vm2, %v1677_v33  ;;  %v1672_v49 = vadd.f32 %v3428_v17, %v1671_v34 }
 0x2a8   : > { %v2601_v36 = vpop.f32.mrf.mxu0 }
 0x2a9   : > { %1903 = vst.msk [vmem:[%s3435_s22 + $0xb0] sm:$0xff] %vm1880_vm2, %v1672_v49  ;;  %v1687_v35 = vadd.f32 %v2601_v36, %v3428_v17 }
 0x2aa   : > { %v1681_v37 = vpop.f32.mrf.mxu0 }
 0x2ab   : > { %1906 = vst.msk [vmem:[%s3435_s22 + $0xc8] sm:$0xff] %vm1880_vm2, %v1687_v35  ;;  %v1682_v40 = vadd.f32 %v3428_v17, %v1681_v37 }
 0x2ac   : > { %v2604_v59 = vpop.f32.mrf.mxu0 }
 0x2ad   : > { %1905 = vst.msk [vmem:[%s3435_s22 + $0xc0] sm:$0xff] %vm1880_vm2, %v1682_v40  ;;  %v1697_v41 = vadd.f32 %v2604_v59, %v3428_v17 }
 0x2ae   : > { %v1691_v42 = vpop.f32.mrf.mxu0 }
 0x2af   : > { %1908 = vst.msk [vmem:[%s3435_s22 + $0xd8] sm:$0xff] %vm1880_vm2, %v1697_v41  ;;  %v1692_v44 = vadd.f32 %v3428_v17, %v1691_v42 }
 0x2b0   : > { %v2607_v43 = vpop.f32.mrf.mxu0 }
 0x2b1   : > { %1907 = vst.msk [vmem:[%s3435_s22 + $0xd0] sm:$0xff] %vm1880_vm2, %v1692_v44  ;;  %v1707_v45 = vadd.f32 %v2607_v43, %v3428_v17 }
 0x2b2   : > { %v1701_v9 = vpop.f32.mrf.mxu0 }
 0x2b3   : > { %1910 = vst.msk [vmem:[%s3435_s22 + $0xe8] sm:$0xff] %vm1880_vm2, %v1707_v45  ;;  %v1702_v46 = vadd.f32 %v3428_v17, %v1701_v9 }
 0x2b4   : > { %v2610_v54 = vpop.f32.mrf.mxu0 }
 0x2b5   : > { %1909 = vst.msk [vmem:[%s3435_s22 + $0xe0] sm:$0xff] %vm1880_vm2, %v1702_v46  ;;  %v1717_v48 = vadd.f32 %v2610_v54, %v3428_v17 }
 0x2b6   : > { %v1711_v50 = vpop.f32.mrf.mxu0 }
 0x2b7   : > { %1912 = vst.msk [vmem:[%s3435_s22 + $0xf8] sm:$0xff] %vm1880_vm2, %v1717_v48  ;;  %v1712_v28 = vadd.f32 %v3428_v17, %v1711_v50 }
 0x2b8   : > { %v2613_v51 = vpop.f32.mrf.mxu0 }
 0x2b9   : > { %1911 = vst.msk [vmem:[%s3435_s22 + $0xf0] sm:$0xff] %vm1880_vm2, %v1712_v28  ;;  %v1727_v0 = vadd.f32 %v2613_v51, %v3428_v17 }
 0x2ba   : > { %v1721_v52 = vpop.f32.mrf.mxu0 }
 0x2bb   : > { %1914 = vst.msk [vmem:[%s3435_s22 + $0x108] sm:$0xff] %vm1880_vm2, %v1727_v0  ;;  %v1722_v53 = vadd.f32 %v3428_v17, %v1721_v52 }
 0x2bc   : > { %v2616_v47 = vpop.f32.mrf.mxu0 }
 0x2bd   : > { %1913 = vst.msk [vmem:[%s3435_s22 + $0x100] sm:$0xff] %vm1880_vm2, %v1722_v53  ;;  %v1737_v55 = vadd.f32 %v2616_v47, %v3428_v17 }
 0x2be   : > { %v1731_v19 = vpop.f32.mrf.mxu0 }
 0x2bf   : > { %1916 = vst.msk [vmem:[%s3435_s22 + $0x118] sm:$0xff] %vm1880_vm2, %v1737_v55  ;;  %v1732_v57 = vadd.f32 %v3428_v17, %v1731_v19 }
 0x2c0   : > { %v2619_v58 = vpop.f32.mrf.mxu0 }
 0x2c1   : > { %1915 = vst.msk [vmem:[%s3435_s22 + $0x110] sm:$0xff] %vm1880_vm2, %v1732_v57  ;;  %v1747_v60 = vadd.f32 %v2619_v58, %v3428_v17 }
 0x2c2   : > { %v1741_v39 = vpop.f32.mrf.mxu0 }
 0x2c3   : > { %1918 = vst.msk [vmem:[%s3435_s22 + $0x128] sm:$0xff] %vm1880_vm2, %v1747_v60  ;;  %v1742_v61 = vadd.f32 %v3428_v17, %v1741_v39 }
 0x2c4   : > { %v2622_v62 = vpop.f32.mrf.mxu0 }
 0x2c5   : > { %1917 = vst.msk [vmem:[%s3435_s22 + $0x120] sm:$0xff] %vm1880_vm2, %v1742_v61  ;;  %v1757_v63 = vadd.f32 %v2622_v62, %v3428_v17 }
 0x2c6   : > { %v1751_v1 = vpop.f32.mrf.mxu0 }
 0x2c7   : > { %1920 = vst.msk [vmem:[%s3435_s22 + $0x138] sm:$0xff] %vm1880_vm2, %v1757_v63  ;;  %v1752_v2 = vadd.f32 %v3428_v17, %v1751_v1 }
 0x2c8   : > { %v2625_v3 = vpop.f32.mrf.mxu0 }
 0x2c9   : > { %1919 = vst.msk [vmem:[%s3435_s22 + $0x130] sm:$0xff] %vm1880_vm2, %v1752_v2  ;;  %v1767_v56 = vadd.f32 %v2625_v3, %v3428_v17 }
 0x2ca   : > { %v1761_v4 = vpop.f32.mrf.mxu0 }
 0x2cb   : > { %1922 = vst.msk [vmem:[%s3435_s22 + $0x148] sm:$0xff] %vm1880_vm2, %v1767_v56  ;;  %v1762_v5 = vadd.f32 %v3428_v17, %v1761_v4 }
 0x2cc   : > { %v2628_v6 = vpop.f32.mrf.mxu0 }
 0x2cd   : > { %1921 = vst.msk [vmem:[%s3435_s22 + $0x140] sm:$0xff] %vm1880_vm2, %v1762_v5  ;;  %v1777_v7 = vadd.f32 %v2628_v6, %v3428_v17 }
 0x2ce   : > { %v1771_v10 = vpop.f32.mrf.mxu0 }
 0x2cf   : > { %1924 = vst.msk [vmem:[%s3435_s22 + $0x158] sm:$0xff] %vm1880_vm2, %v1777_v7  ;;  %v1772_v11 = vadd.f32 %v3428_v17, %v1771_v10 }
 0x2d0   : > { %v2631_v8 = vpop.f32.mrf.mxu0 }
 0x2d1   : > { %1923 = vst.msk [vmem:[%s3435_s22 + $0x150] sm:$0xff] %vm1880_vm2, %v1772_v11  ;;  %v1787_v12 = vadd.f32 %v2631_v8, %v3428_v17 }
 0x2d2   : > { %v1781_v13 = vpop.f32.mrf.mxu0 }
 0x2d3   : > { %1926 = vst.msk [vmem:[%s3435_s22 + $0x168] sm:$0xff] %vm1880_vm2, %v1787_v12  ;;  %v1782_v14 = vadd.f32 %v3428_v17, %v1781_v13 }
 0x2d4   : > { %v2634_v15 = vpop.f32.mrf.mxu0 }
 0x2d5   : > { %1925 = vst.msk [vmem:[%s3435_s22 + $0x160] sm:$0xff] %vm1880_vm2, %v1782_v14  ;;  %v1797_v16 = vadd.f32 %v2634_v15, %v3428_v17 }
 0x2d6   : > { %v1791_v18 = vpop.f32.mrf.mxu0 }
 0x2d7   : > { %1928 = vst.msk [vmem:[%s3435_s22 + $0x178] sm:$0xff] %vm1880_vm2, %v1797_v16  ;;  %v1792_v20 = vadd.f32 %v3428_v17, %v1791_v18 }
 0x2d8   : > { %v2637_v21 = vpop.f32.mrf.mxu0 }
 0x2d9   : > { %1927 = vst.msk [vmem:[%s3435_s22 + $0x170] sm:$0xff] %vm1880_vm2, %v1792_v20  ;;  %v1807_v22 = vadd.f32 %v2637_v21, %v3428_v17 }
 0x2da   : > { %v1801_v23 = vpop.f32.mrf.mxu0 }
 0x2db   : > { %1930 = vst.msk [vmem:[%s3435_s22 + $0x188] sm:$0xff] %vm1880_vm2, %v1807_v22  ;;  %v1802_v32 = vadd.f32 %v3428_v17, %v1801_v23 }
 0x2dc   : > { %v2640_v24 = vpop.f32.mrf.mxu0 }
 0x2dd   : > { %1929 = vst.msk [vmem:[%s3435_s22 + $0x180] sm:$0xff] %vm1880_vm2, %v1802_v32  ;;  %v1817_v25 = vadd.f32 %v2640_v24, %v3428_v17 }
 0x2de   : > { %v1811_v26 = vpop.f32.mrf.mxu0 }
 0x2df   : > { %1932 = vst.msk [vmem:[%s3435_s22 + $0x198] sm:$0xff] %vm1880_vm2, %v1817_v25  ;;  %v1812_v27 = vadd.f32 %v3428_v17, %v1811_v26 }
 0x2e0   : > { %v2643_v30 = vpop.f32.mrf.mxu0 }
 0x2e1   : > { %1931 = vst.msk [vmem:[%s3435_s22 + $0x190] sm:$0xff] %vm1880_vm2, %v1812_v27  ;;  %v1827_v38 = vadd.f32 %v2643_v30, %v3428_v17 }
 0x2e2   : > { %v1821_v31 = vpop.f32.mrf.mxu0 }
 0x2e3   : > { %1934 = vst.msk [vmem:[%s3435_s22 + $0x1a8] sm:$0xff] %vm1880_vm2, %v1827_v38  ;;  %v1822_v29 = vadd.f32 %v3428_v17, %v1821_v31 }
 0x2e4   : > { %v2646_v33 = vpop.f32.mrf.mxu0 }
 0x2e5   : > { %1933 = vst.msk [vmem:[%s3435_s22 + $0x1a0] sm:$0xff] %vm1880_vm2, %v1822_v29  ;;  %v1837_v34 = vadd.f32 %v2646_v33, %v3428_v17 }
 0x2e6   : > { %v1831_v49 = vpop.f32.mrf.mxu0 }
 0x2e7   : > { %1936 = vst.msk [vmem:[%s3435_s22 + $0x1b8] sm:$0xff] %vm1880_vm2, %v1837_v34  ;;  %v1832_v36 = vadd.f32 %v3428_v17, %v1831_v49 }
 0x2e8   : > { %v2649_v35 = vpop.f32.mrf.mxu0 }
 0x2e9   : > { %1935 = vst.msk [vmem:[%s3435_s22 + $0x1b0] sm:$0xff] %vm1880_vm2, %v1832_v36  ;;  %v1847_v37 = vadd.f32 %v2649_v35, %v3428_v17 }
 0x2ea   : > { %v1841_v40 = vpop.f32.mrf.mxu0 }
 0x2eb   : > { %1938 = vst.msk [vmem:[%s3435_s22 + $0x1c8] sm:$0xff] %vm1880_vm2, %v1847_v37  ;;  %v1842_v59 = vadd.f32 %v3428_v17, %v1841_v40 }
 0x2ec   : > { %v2652_v41 = vpop.f32.mrf.mxu0 }
 0x2ed   : > { %1937 = vst.msk [vmem:[%s3435_s22 + $0x1c0] sm:$0xff] %vm1880_vm2, %v1842_v59  ;;  %v1857_v42 = vadd.f32 %v2652_v41, %v3428_v17 }
 0x2ee   : > { %v1851_v44 = vpop.f32.mrf.mxu0 }
 0x2ef   : > { %1940 = vst.msk [vmem:[%s3435_s22 + $0x1d8] sm:$0xff] %vm1880_vm2, %v1857_v42  ;;  %v1852_v43 = vadd.f32 %v3428_v17, %v1851_v44 }
 0x2f0   : > { %v2655_v45 = vpop.f32.mrf.mxu0 }
 0x2f1   : > { %1939 = vst.msk [vmem:[%s3435_s22 + $0x1d0] sm:$0xff] %vm1880_vm2, %v1852_v43  ;;  %v1867_v9 = vadd.f32 %v2655_v45, %v3428_v17 }
 0x2f2   : > { %v1861_v46 = vpop.f32.mrf.mxu0 }
 0x2f3   : > { %1942 = vst.msk [vmem:[%s3435_s22 + $0x1e8] sm:$0xff] %vm1880_vm2, %v1867_v9  ;;  %v1862_v54 = vadd.f32 %v3428_v17, %v1861_v46 }
 0x2f4   : > { %v2658_v48 = vpop.f32.mrf.mxu0 }
 0x2f5   : > { %1941 = vst.msk [vmem:[%s3435_s22 + $0x1e0] sm:$0xff] %vm1880_vm2, %v1862_v54  ;;  %v1877_v50 = vadd.f32 %v2658_v48, %v3428_v17 }
 0x2f6   : > { %v1871_v28 = vpop.f32.mrf.mxu0 }
 0x2f7   : > { %1944 = vst.msk [vmem:[%s3435_s22 + $0x1f8] sm:$0xff] %vm1880_vm2, %v1877_v50  ;;  %v1872_v51 = vadd.f32 %v3428_v17, %v1871_v28 }
 0x2f9   : > { %1943 = vst.msk [vmem:[%s3435_s22 + $0x1f0] sm:$0xff] %vm1880_vm2, %v1872_v51 }
 0x2fa PF: > { %s17_s24 = sadd.s32 1, %s2931_s24  }
 0x2fb   : > { %p14_p4 = scmp.ge.s32.totalorder %s17_s24, 4  }
 0x2fd   :  { %16 = sbr.rel (!%p14_p4) target bundleno = 1 (0x1), region = 78 }

</bundles_post_ra>
